<compile_context>
chip_gen: v5e
topology: v5e:2x2
jax: 0.10.0
libtpu: 0.0.40
codegen_flags: <defaults>
</compile_context>

<pallas_src>
import functools

import jax
import jax.numpy as jnp
from jax.experimental import pallas as pl
from jax.experimental.pallas import tpu as pltpu


def _round_up(n, m):
    return ((n + m - 1) // m) * m


def _softplus(z):
    # Matches torch.nn.Softplus(beta=1, threshold=20):
    #   softplus(x) = x                if x > 20
    #               = log(1 + exp(x))  otherwise
    return jnp.where(z > 20.0, z, jnp.log1p(jnp.exp(jnp.minimum(z, 20.0))))


def phi_mapper_kernel(x_ref,
                      w1_ref, b1_ref,
                      w2_ref, b2_ref,
                      w3_ref, b3_ref,
                      w4_row_ref, b4_ref,
                      out_ref):
    # x tile arrives f32; cast to bf16 here (VPU work, hidden under the MXU)
    # so the wrapper does not need a separate HBM-pass cast op.
    x_bf = x_ref[...].astype(jnp.bfloat16)
    h1 = jnp.dot(x_bf, w1_ref[...], preferred_element_type=jnp.float32)
    h1 = jnp.maximum(h1 + b1_ref[...], 0.0)

    h2 = jnp.dot(h1.astype(jnp.bfloat16), w2_ref[...],
                 preferred_element_type=jnp.float32)
    h2 = jnp.maximum(h2 + b2_ref[...], 0.0)

    h3 = jnp.dot(h2.astype(jnp.bfloat16), w3_ref[...],
                 preferred_element_type=jnp.float32)
    h3 = jnp.maximum(h3 + b3_ref[...], 0.0)

    # Final H -> 1 layer: VPU multiply + XLU lane reduction (an MXU matmul
    # would only use 1 of 128+ output columns). b4 is a scalar read from SMEM.
    z = jnp.sum(h3 * w4_row_ref[...], axis=-1, keepdims=True) + b4_ref[0]
    out_ref[...] = _softplus(z).astype(out_ref.dtype)


@functools.partial(jax.jit, static_argnames=("block_b",))
def phi_mapper_forward(x, params, *, block_b=512):
    """Fused 4-layer MLP + Softplus. x: (B, F_in) f32 -> (B, 1) f32."""
    w1, b1, w2, b2, w3, b3, w4, b4 = params
    B, F_in = x.shape
    H = w1.shape[1]

    # Batch tile: aligned to the 256 MXU M-granule (also a multiple of v5e's
    # 128); for large B aim for >=2 even grid steps so v7x's two TensorCores
    # both get work via dimension_semantics=("parallel",).
    granule = 256
    half = -(-B // 2)  # ceil(B / 2)
    block = min(block_b, _round_up(half, granule), _round_up(B, granule))
    B_pad = _round_up(B, block)
    x_f32 = x.astype(jnp.float32)
    if B_pad != B:
        x_f32 = jnp.pad(x_f32, ((0, B_pad - B), (0, 0)))

    # bf16 operands for the MXU layers (one-time, B-independent casts);
    # biases / w4 row / all elementwise math stay f32.
    w1_bf = w1.astype(jnp.bfloat16)
    w2_bf = w2.astype(jnp.bfloat16)
    w3_bf = w3.astype(jnp.bfloat16)

    b1_2d = b1.reshape(1, H).astype(jnp.float32)
    b2_2d = b2.reshape(1, H).astype(jnp.float32)
    b3_2d = b3.reshape(1, H).astype(jnp.float32)
    w4_row = w4.reshape(1, H).astype(jnp.float32)   # (H,1) -> (1,H) row for VPU
    b4_1d = b4.reshape(1).astype(jnp.float32)       # scalar, lives in SMEM

    full = lambda i: (0, 0)           # grid-invariant params
    single = pl.Buffered(1)           # never re-fetched -> no double buffer

    grid_spec = pltpu.PrefetchScalarGridSpec(
        num_scalar_prefetch=0,
        grid=(B_pad // block,),
        in_specs=[
            pl.BlockSpec((block, F_in), lambda i: (i, 0)),            # x tile
            pl.BlockSpec((F_in, H), full, pipeline_mode=single),      # W1
            pl.BlockSpec((1, H), full, pipeline_mode=single),         # b1
            pl.BlockSpec((H, H), full, pipeline_mode=single),         # W2
            pl.BlockSpec((1, H), full, pipeline_mode=single),         # b2
            pl.BlockSpec((H, H), full, pipeline_mode=single),         # W3
            pl.BlockSpec((1, H), full, pipeline_mode=single),         # b3
            pl.BlockSpec((1, H), full, pipeline_mode=single),         # W4 row
            pl.BlockSpec(memory_space=pltpu.MemorySpace.SMEM),        # b4
        ],
        out_specs=pl.BlockSpec((block, 1), lambda i: (i, 0)),
    )

    # VMEM estimate: double-buffered x/out tiles, single-buffered resident
    # params, the (block, H) f32 intermediates + their bf16 casts, plus slack.
    # Cap at 48 MiB so the layout stays inside v7x's 64 MiB physical VMEM;
    # floor at 32 MiB so v5e's 16 MiB scoped default never clamps the tile.
    est = (2 * block * F_in * 4                      # x tiles (f32, dbl-buf)
           + 2 * block * 128 * 4                     # out tiles (lane-padded)
           + (F_in * H + 2 * H * H) * 2              # W1-W3 bf16, single-buf
           + 4 * H * 4                               # b1-b3 + w4 row (f32)
           + 3 * block * H * 4                       # h1-h3 f32 intermediates
           + (block * F_in + 2 * block * H) * 2      # in-kernel bf16 casts
           + (4 << 20))                              # compiler slack
    vmem_limit = int(min(max(32 << 20, est), 48 << 20))

    out = pl.pallas_call(
        phi_mapper_kernel,
        out_shape=jax.ShapeDtypeStruct((B_pad, 1), jnp.float32),
        grid_spec=grid_spec,
        compiler_params=pltpu.CompilerParams(
            dimension_semantics=("parallel",),
            vmem_limit_bytes=vmem_limit),
    )(x_f32, w1_bf, b1_2d, w2_bf, b2_2d, w3_bf, b3_2d, w4_row, b4_1d)

    return out[:B]


def init_phi_params(key, features_in, hidden_dims):
    """Deterministic synthetic params (shapes match the PyTorch module)."""
    ks = jax.random.split(key, 8)
    s = 0.05
    w1 = s * jax.random.normal(ks[0], (features_in, hidden_dims), jnp.float32)
    b1 = s * jax.random.normal(ks[1], (hidden_dims,), jnp.float32)
    w2 = s * jax.random.normal(ks[2], (hidden_dims, hidden_dims), jnp.float32)
    b2 = s * jax.random.normal(ks[3], (hidden_dims,), jnp.float32)
    w3 = s * jax.random.normal(ks[4], (hidden_dims, hidden_dims), jnp.float32)
    b3 = s * jax.random.normal(ks[5], (hidden_dims,), jnp.float32)
    w4 = s * jax.random.normal(ks[6], (hidden_dims, 1), jnp.float32)
    b4 = s * jax.random.normal(ks[7], (1,), jnp.float32)
    return (w1, b1, w2, b2, w3, b3, w4, b4)


def phi_mapper_ref(x, params):
    """Pure-JAX f32 reference (mirrors the PyTorch forward)."""
    w1, b1, w2, b2, w3, b3, w4, b4 = params
    h = jnp.maximum(x @ w1 + b1, 0.0)
    h = jnp.maximum(h @ w2 + b2, 0.0)
    h = jnp.maximum(h @ w3 + b3, 0.0)
    z = h @ w4 + b4
    return _softplus(z)


if __name__ == "__main__":
    key = jax.random.PRNGKey(0)
    k_x, k_p = jax.random.split(key)

    batch = 512            # -> 2 grid steps of 256 (even split for v7x)
    features_in = 32
    hidden_dims = 128      # small, lane-aligned stand-in for the default 512

    x = jax.random.normal(k_x, (batch, features_in), jnp.float32)
    params = init_phi_params(k_p, features_in, hidden_dims)

    out = phi_mapper_forward(x, params)
    out = jax.block_until_ready(out)

    ref = phi_mapper_ref(x, params)
    assert out.shape == (batch, 1), out.shape
    # bf16 matmul operands with f32 accumulation -> relaxed tolerance vs f32 ref.
    assert jnp.allclose(out, ref, atol=1e-2, rtol=1e-2), (
        float(jnp.max(jnp.abs(out - ref))))

    print("KERNEL_OK")
</pallas_src>

<mosaic_0001>
module attributes {stable_mosaic.version = 11 : i64} {
  func.func @phi_mapper_kernel(%arg0: i32, %arg1: memref<256x32xf32, #tpu.memory_space<vmem>>, %arg2: memref<32x128xbf16, #tpu.memory_space<vmem>>, %arg3: memref<1x128xf32, #tpu.memory_space<vmem>>, %arg4: memref<128x128xbf16, #tpu.memory_space<vmem>>, %arg5: memref<1x128xf32, #tpu.memory_space<vmem>>, %arg6: memref<128x128xbf16, #tpu.memory_space<vmem>>, %arg7: memref<1x128xf32, #tpu.memory_space<vmem>>, %arg8: memref<1x128xf32, #tpu.memory_space<vmem>>, %arg9: memref<1xf32, #tpu.memory_space<smem>>, %arg10: memref<256x1xf32, #tpu.memory_space<vmem>>) attributes {dimension_semantics = [#tpu.dimension_semantics<parallel>], iteration_bounds = array<i64: 2>, scalar_prefetch = 0 : i64, scratch_operands = 0 : i64, tpu.core_type = #tpu.core_type<tc>, window_params = [{transform_indices = @transform_0, window_bounds = array<i64: 256, 32>}, {pipeline_mode = #tpu.pipeline_mode<synchronous>, transform_indices = @transform_1, window_bounds = array<i64: 32, 128>}, {pipeline_mode = #tpu.pipeline_mode<synchronous>, transform_indices = @transform_2, window_bounds = array<i64: 1, 128>}, {pipeline_mode = #tpu.pipeline_mode<synchronous>, transform_indices = @transform_3, window_bounds = array<i64: 128, 128>}, {pipeline_mode = #tpu.pipeline_mode<synchronous>, transform_indices = @transform_4, window_bounds = array<i64: 1, 128>}, {pipeline_mode = #tpu.pipeline_mode<synchronous>, transform_indices = @transform_5, window_bounds = array<i64: 128, 128>}, {pipeline_mode = #tpu.pipeline_mode<synchronous>, transform_indices = @transform_6, window_bounds = array<i64: 1, 128>}, {pipeline_mode = #tpu.pipeline_mode<synchronous>, transform_indices = @transform_7, window_bounds = array<i64: 1, 128>}, {transform_indices = @transform_8, window_bounds = array<i64: 1>}, {transform_indices = @transform_9, window_bounds = array<i64: 256, 1>}]} {
    %c0 = arith.constant 0 : index
    %c0_0 = arith.constant 0 : index
    %0 = vector.load %arg1[%c0, %c0_0] : memref<256x32xf32, #tpu.memory_space<vmem>>, vector<256x32xf32>
    %1 = arith.truncf %0 : vector<256x32xf32> to vector<256x32xbf16>
    %c0_1 = arith.constant 0 : index
    %c0_2 = arith.constant 0 : index
    %2 = vector.load %arg2[%c0_1, %c0_2] : memref<32x128xbf16, #tpu.memory_space<vmem>>, vector<32x128xbf16>
    %cst = arith.constant dense<0.000000e+00> : vector<256x128xf32>
    %3 = tpu.matmul %1, %2, %cst {dimension_numbers = #tpu.dot_dimension_numbers<[1], [0], [0], [1], [0, 0, 1, 1], [], []>} : vector<256x32xbf16>, vector<32x128xbf16>, vector<256x128xf32> -> vector<256x128xf32>
    %c0_3 = arith.constant 0 : index
    %c0_4 = arith.constant 0 : index
    %4 = vector.load %arg3[%c0_3, %c0_4] : memref<1x128xf32, #tpu.memory_space<vmem>>, vector<1x128xf32>
    %5 = vector.broadcast %4 : vector<1x128xf32> to vector<256x128xf32>
    %6 = arith.addf %3, %5 : vector<256x128xf32>
    %cst_5 = arith.constant 0.000000e+00 : f32
    %7 = vector.broadcast %cst_5 : f32 to vector<256x128xf32>
    %8 = arith.maximumf %6, %7 : vector<256x128xf32>
    %9 = arith.truncf %8 : vector<256x128xf32> to vector<256x128xbf16>
    %c0_6 = arith.constant 0 : index
    %c0_7 = arith.constant 0 : index
    %10 = vector.load %arg4[%c0_6, %c0_7] : memref<128x128xbf16, #tpu.memory_space<vmem>>, vector<128x128xbf16>
    %cst_8 = arith.constant dense<0.000000e+00> : vector<256x128xf32>
    %11 = tpu.matmul %9, %10, %cst_8 {dimension_numbers = #tpu.dot_dimension_numbers<[1], [0], [0], [1], [0, 0, 1, 1], [], []>} : vector<256x128xbf16>, vector<128x128xbf16>, vector<256x128xf32> -> vector<256x128xf32>
    %c0_9 = arith.constant 0 : index
    %c0_10 = arith.constant 0 : index
    %12 = vector.load %arg5[%c0_9, %c0_10] : memref<1x128xf32, #tpu.memory_space<vmem>>, vector<1x128xf32>
    %13 = vector.broadcast %12 : vector<1x128xf32> to vector<256x128xf32>
    %14 = arith.addf %11, %13 : vector<256x128xf32>
    %cst_11 = arith.constant 0.000000e+00 : f32
    %15 = vector.broadcast %cst_11 : f32 to vector<256x128xf32>
    %16 = arith.maximumf %14, %15 : vector<256x128xf32>
    %17 = arith.truncf %16 : vector<256x128xf32> to vector<256x128xbf16>
    %c0_12 = arith.constant 0 : index
    %c0_13 = arith.constant 0 : index
    %18 = vector.load %arg6[%c0_12, %c0_13] : memref<128x128xbf16, #tpu.memory_space<vmem>>, vector<128x128xbf16>
    %cst_14 = arith.constant dense<0.000000e+00> : vector<256x128xf32>
    %19 = tpu.matmul %17, %18, %cst_14 {dimension_numbers = #tpu.dot_dimension_numbers<[1], [0], [0], [1], [0, 0, 1, 1], [], []>} : vector<256x128xbf16>, vector<128x128xbf16>, vector<256x128xf32> -> vector<256x128xf32>
    %c0_15 = arith.constant 0 : index
    %c0_16 = arith.constant 0 : index
    %20 = vector.load %arg7[%c0_15, %c0_16] : memref<1x128xf32, #tpu.memory_space<vmem>>, vector<1x128xf32>
    %21 = vector.broadcast %20 : vector<1x128xf32> to vector<256x128xf32>
    %22 = arith.addf %19, %21 : vector<256x128xf32>
    %cst_17 = arith.constant 0.000000e+00 : f32
    %23 = vector.broadcast %cst_17 : f32 to vector<256x128xf32>
    %24 = arith.maximumf %22, %23 : vector<256x128xf32>
    %c0_18 = arith.constant 0 : index
    %c0_19 = arith.constant 0 : index
    %25 = vector.load %arg8[%c0_18, %c0_19] : memref<1x128xf32, #tpu.memory_space<vmem>>, vector<1x128xf32>
    %26 = vector.broadcast %25 : vector<1x128xf32> to vector<256x128xf32>
    %27 = arith.mulf %24, %26 : vector<256x128xf32>
    %cst_20 = arith.constant dense<0.000000e+00> : vector<256xf32>
    %28 = vector.multi_reduction <add>, %27, %cst_20 [1] : vector<256x128xf32> to vector<256xf32>
    %29 = vector.shape_cast %28 : vector<256xf32> to vector<256x1xf32>
    %c0_21 = arith.constant 0 : index
    %30 = memref.load %arg9[%c0_21] : memref<1xf32, #tpu.memory_space<smem>>
    %31 = vector.broadcast %30 : f32 to vector<256x1xf32>
    %32 = arith.addf %29, %31 : vector<256x1xf32>
    %cst_22 = arith.constant 2.000000e+01 : f32
    %33 = vector.broadcast %cst_22 : f32 to vector<256x1xf32>
    %34 = arith.cmpf ogt, %32, %33 : vector<256x1xf32>
    %cst_23 = arith.constant 2.000000e+01 : f32
    %35 = vector.broadcast %cst_23 : f32 to vector<256x1xf32>
    %36 = arith.minimumf %32, %35 : vector<256x1xf32>
    %37 = math.exp %36 : vector<256x1xf32>
    %38 = math.log1p %37 : vector<256x1xf32>
    %39 = arith.select %34, %32, %38 : vector<256x1xi1>, vector<256x1xf32>
    %c0_24 = arith.constant 0 : index
    %c0_25 = arith.constant 0 : index
    %40 = vector.load %arg10[%c0_24, %c0_25] : memref<256x1xf32, #tpu.memory_space<vmem>>, vector<256x1xf32>
    tpu.vector_store %arg10[%c0_24, %c0_25], %39 {strides = array<i32>} : memref<256x1xf32, #tpu.memory_space<vmem>>, vector<256x1xf32>,
    return
  }
  func.func @transform_0(%arg0: i32) -> (i32, i32) {
    %c0_i32 = arith.constant 0 : i32
    %c0_i32_0 = arith.constant 0 : i32
    return %arg0, %c0_i32 : i32, i32
  }
  func.func @transform_1(%arg0: i32) -> (i32, i32) {
    %c0_i32 = arith.constant 0 : i32
    %c0_i32_0 = arith.constant 0 : i32
    %c0_i32_1 = arith.constant 0 : i32
    return %c0_i32, %c0_i32_0 : i32, i32
  }
  func.func @transform_2(%arg0: i32) -> (i32, i32) {
    %c0_i32 = arith.constant 0 : i32
    %c0_i32_0 = arith.constant 0 : i32
    %c0_i32_1 = arith.constant 0 : i32
    return %c0_i32, %c0_i32_0 : i32, i32
  }
  func.func @transform_3(%arg0: i32) -> (i32, i32) {
    %c0_i32 = arith.constant 0 : i32
    %c0_i32_0 = arith.constant 0 : i32
    %c0_i32_1 = arith.constant 0 : i32
    return %c0_i32, %c0_i32_0 : i32, i32
  }
  func.func @transform_4(%arg0: i32) -> (i32, i32) {
    %c0_i32 = arith.constant 0 : i32
    %c0_i32_0 = arith.constant 0 : i32
    %c0_i32_1 = arith.constant 0 : i32
    return %c0_i32, %c0_i32_0 : i32, i32
  }
  func.func @transform_5(%arg0: i32) -> (i32, i32) {
    %c0_i32 = arith.constant 0 : i32
    %c0_i32_0 = arith.constant 0 : i32
    %c0_i32_1 = arith.constant 0 : i32
    return %c0_i32, %c0_i32_0 : i32, i32
  }
  func.func @transform_6(%arg0: i32) -> (i32, i32) {
    %c0_i32 = arith.constant 0 : i32
    %c0_i32_0 = arith.constant 0 : i32
    %c0_i32_1 = arith.constant 0 : i32
    return %c0_i32, %c0_i32_0 : i32, i32
  }
  func.func @transform_7(%arg0: i32) -> (i32, i32) {
    %c0_i32 = arith.constant 0 : i32
    %c0_i32_0 = arith.constant 0 : i32
    %c0_i32_1 = arith.constant 0 : i32
    return %c0_i32, %c0_i32_0 : i32, i32
  }
  func.func @transform_8(%arg0: i32) -> i32 {
    %c0_i32 = arith.constant 0 : i32
    %c0_i32_0 = arith.constant 0 : i32
    return %c0_i32 : i32
  }
  func.func @transform_9(%arg0: i32) -> (i32, i32) {
    %c0_i32 = arith.constant 0 : i32
    %c0_i32_0 = arith.constant 0 : i32
    return %arg0, %c0_i32 : i32, i32
  }
}

</mosaic_0001>

<bundles_post_ra>
// kernel: phi_mapper_forward.1
= control target key start
LH: loop header
LB: loop body
LE: loop exit
PB: predicated region body
PF: predicated region fallthrough
CT: control target
= control target key end

     0   :  { %s1994_s11 = smov 0   ;;  %s2452_s0 = inlined_call_operand.vmem [shape: f32[512,32], index: 0, kind: input, shape index: {}]   ;;  %s2453_s1 = inlined_call_operand.vmem [shape: bf16[32,128], index: 1, kind: input, shape index: {}]   ;;  %s2454_s2 = inlined_call_operand.vmem [shape: f32[1,128], index: 2, kind: input, shape index: {}]   ;;  %s2455_s3 = inlined_call_operand.vmem [shape: bf16[128,128], index: 3, kind: input, shape index: {}]   ;;  %s2456_s4 = inlined_call_operand.vmem [shape: f32[1,128], index: 4, kind: input, shape index: {}]   ;;  %s2457_s5 = inlined_call_operand.vmem [shape: bf16[128,128], index: 5, kind: input, shape index: {}]   ;;  %s2458_s6 = inlined_call_operand.vmem [shape: f32[1,128], index: 6, kind: input, shape index: {}]   ;;  %s2459_s7 = inlined_call_operand.vmem [shape: f32[1,128], index: 7, kind: input, shape index: {}]   ;;  %s2460_s8 = inlined_call_operand.<no memory space> [shape: f32[1], index: 8, kind: input, shape index: {}]   ;;  %s2461_s9 = inlined_call_operand.vmem [shape: f32[512,1], index: 9, kind: output, shape index: {}]  }
   0x1   :  { %14 = sst [smem:[#allocation2]] %s2460_s8 }
   0x2 LB: > { %s1657_s12 = sadd.s32 4294967295, %s1939_s11   ;;  %p1661_p0 = scmp.ge.s32.totalorder %s1939_s11, 1  ;;  %s1939_s11 = sphi %s1994_s11, %s20_s11  }
   0x3   : > { %p289_p1 = scmp.lt.s32.totalorder %s1939_s11, 3 }
   0x5   : > { %p290_p2 = pnand %p1661_p0, %p289_p1 }
   0x6   : > { %s1662_s8 = sshll.u32 (!%p290_p2), %s1657_s12, 5  ;;  %s1086_s23 = sld [smem:[#allocation2]] (!%p290_p2) }
   0x7   : > { %293 = sbr.rel (%p290_p2) target bundleno = 835 (0x343), region = 56  ;;  %p326_p3 = scmp.lt.s32.totalorder (!%p290_p2), %s1662_s8, 63 }
   0xc   : > { %v1757_v0 = vld [vmem:[%s2453_s1 + $0x8] sm:$0xff]  ;;  %v1756_v1 = vld [vmem:[%s2453_s1] sm:$0xff]  ;;  %s2463_s8 = smov (!%p326_p3, %s1662_s8), 63  ;;  %vm406_vm0 = vcmask 261120   ;;  %v1765_v17 = vld [vmem:[%s2455_s3 + $0x38] sm:$0xff]  ;;  %vm1568_vm1 = vcmask 7168  }
   0xd   : > { %461 = vmatpush.bf16.msra.mxu0 %v1757_v0  ;;  %1774 = vmatpush.bf16.msra.mxu3 %v1757_v0  ;;  %s1663_s17 = sshll.u32 %s2463_s8, 3  ;;  %v1764_v21 = vld [vmem:[%s2455_s3 + $0x30] sm:$0xff]  ;;  %v1763_v22 = vld [vmem:[%s2455_s3 + $0x28] sm:$0xff]  ;;  %v1762_v23 = vld [vmem:[%s2455_s3 + $0x20] sm:$0xff] }
   0xe   : > { %s2016_s20 = scalar_lea.vmem %s2452_s0, %s1663_s17  ;;  %660 = vmatpush.bf16.msra.mxu1 %v1765_v17  ;;  %v1761_v26 = vld [vmem:[%s2455_s3 + $0x18] sm:$0xff]  ;;  %v1760_v28 = vld [vmem:[%s2455_s3 + $0x10] sm:$0xff]  ;;  %v1759_v29 = vld [vmem:[%s2455_s3 + $0x8] sm:$0xff]  ;;  %s2251_s26 = scalar_lea.vmem %s2461_s9, %s1663_s17 }
   0xf   : > { %v338_v2 = vld [vmem:[%s2016_s20] sm:$0xff]  ;;  %v339_v3 = vld [vmem:[%s2016_s20 + $0x8] sm:$0xff]  ;;  %v340_v5 = vld [vmem:[%s2016_s20 + $0x10] sm:$0xff] }
  0x10   : > { %v370_v4 = vpack.c.bf16 %v339_v3, %v338_v2  ;;  %v341_v6 = vld [vmem:[%s2016_s20 + $0x18] sm:$0xff]  ;;  %v342_v8 = vld [vmem:[%s2016_s20 + $0x20] sm:$0xff]  ;;  %v343_v9 = vld [vmem:[%s2016_s20 + $0x28] sm:$0xff] }
  0x11   : > { %462 = vmatpush.bf16.msra.mxu0 %v1756_v1  ;;  %1775 = vmatpush.bf16.msra.mxu3 %v1756_v1  ;;  %v371_v7 = vpack.c.bf16 %v341_v6, %v340_v5  ;;  %v372_v10 = vpack.c.bf16 %v343_v9, %v342_v8  ;;  %v344_v11 = vld [vmem:[%s2016_s20 + $0x30] sm:$0xff]  ;;  %v345_v12 = vld [vmem:[%s2016_s20 + $0x38] sm:$0xff]  ;;  %v346_v14 = vld [vmem:[%s2016_s20 + $0x40] sm:$0xff] }
  0x12   : > { %v373_v13 = vpack.c.bf16 %v345_v12, %v344_v11  ;;  %v347_v15 = vld [vmem:[%s2016_s20 + $0x48] sm:$0xff]  ;;  %v348_v18 = vld [vmem:[%s2016_s20 + $0x50] sm:$0xff]  ;;  %v349_v19 = vld [vmem:[%s2016_s20 + $0x58] sm:$0xff]  ;;  %661 = vmatpush.bf16.msra.mxu1 %v1764_v21 }
  0x13   : > { %v374_v16 = vpack.c.bf16 %v347_v15, %v346_v14  ;;  %v375_v20 = vpack.c.bf16 %v349_v19, %v348_v18  ;;  %v350_v24 = vld [vmem:[%s2016_s20 + $0x60] sm:$0xff]  ;;  %v351_v25 = vld [vmem:[%s2016_s20 + $0x68] sm:$0xff]  ;;  %v352_v31 = vld [vmem:[%s2016_s20 + $0x70] sm:$0xff] }
  0x14   : > { %1674 = vmatmul.msk.bf16.vlgmr.msra.gmra.mxu0 %vm406_vm0, %v370_v4  ;;  %v376_v27 = vpack.c.bf16 %v351_v25, %v350_v24  ;;  %v1758_v30 = vld [vmem:[%s2455_s3] sm:$0xff]  ;;  %v353_v32 = vld [vmem:[%s2016_s20 + $0x78] sm:$0xff]  ;;  %v355_v35 = vld [vmem:[%s2016_s20 + $0x88] sm:$0xff] }
  0x15   : > { %1776 = vmatpush.bf16.msrb.mxu3 %v1765_v17  ;;  %v377_v33 = vpack.c.bf16 %v353_v32, %v352_v31  ;;  %v354_v34 = vld [vmem:[%s2016_s20 + $0x80] sm:$0xff]  ;;  %v356_v44 = vld [vmem:[%s2016_s20 + $0x90] sm:$0xff]  ;;  %v357_v45 = vld [vmem:[%s2016_s20 + $0x98] sm:$0xff] }
  0x16   : > { %662 = vmatpush.bf16.msra.mxu1 %v1763_v22  ;;  %v378_v36 = vpack.c.bf16 %v355_v35, %v354_v34  ;;  %v2071_v38 = vld [vmem:[%s2454_s2] ss:$0 sm:$0xff]  ;;  %v379_v47 = vpack.c.bf16 %v357_v45, %v356_v44  ;;  %v359_v55 = vld [vmem:[%s2016_s20 + $0xa8] sm:$0xff]  ;;  %v364_v59 = vld [vmem:[%s2016_s20 + $0xd0] sm:$0xff] }
  0x17   : > { %v358_v54 = vld [vmem:[%s2016_s20 + $0xa0] sm:$0xff]  ;;  %v365_v60 = vld [vmem:[%s2016_s20 + $0xd8] sm:$0xff]  ;;  %v360_v3 = vld [vmem:[%s2016_s20 + $0xb0] sm:$0xff] }
  0x18   : > { %v380_v57 = vpack.c.bf16 %v359_v55, %v358_v54  ;;  %v383_v61 = vpack.c.bf16 %v365_v60, %v364_v59  ;;  %v361_v4 = vld [vmem:[%s2016_s20 + $0xb8] sm:$0xff]  ;;  %v366_v8 = vld [vmem:[%s2016_s20 + $0xe0] sm:$0xff]  ;;  %v367_v9 = vld [vmem:[%s2016_s20 + $0xe8] sm:$0xff] }
  0x19   : > { %1777 = vmatpush.bf16.msrb.mxu3 %v1764_v21  ;;  %v381_v6 = vpack.c.bf16 %v361_v4, %v360_v3  ;;  %v363_v17 = vld [vmem:[%s2016_s20 + $0xc8] sm:$0xff]  ;;  %v368_v21 = vld [vmem:[%s2016_s20 + $0xf0] sm:$0xff]  ;;  %v1773_v34 = vld [vmem:[%s2457_s5 + $0x38] sm:$0xff] }
  0x1a   : > { %663 = vmatpush.bf16.msra.mxu1 %v1762_v23  ;;  %1687 = vmatmul.msk.bf16.vlgmr.msra.gmra.mxu3 %vm406_vm0, %v383_v61  ;;  %v2140_v4 = vld [vmem:[%s2456_s4] ss:$0 sm:$0xff] }
  0x1b   : > { %865 = vmatpush.bf16.msra.mxu2 %v1773_v34 }
  0x1d   : > { %1778 = vmatpush.bf16.msrb.mxu3 %v1763_v22  ;;  %v369_v22 = vld [vmem:[%s2016_s20 + $0xf8] sm:$0xff] }
  0x1e   : > { %664 = vmatpush.bf16.msra.mxu1 %v1761_v26 }
  0x21   : > { %1779 = vmatpush.bf16.msrb.mxu3 %v1762_v23  ;;  %v385_v23 = vpack.c.bf16 %v369_v22, %v368_v21 }
  0x22   : > { %665 = vmatpush.bf16.msra.mxu1 %v1760_v28 }
  0x24   : > { %1675 = vmatmul.msk.bf16.gmra.mxu0 %vm406_vm0, %v371_v7 }
  0x25   : > { %1780 = vmatpush.bf16.msrb.mxu3 %v1761_v26 }
  0x26   : > { %666 = vmatpush.bf16.msra.mxu1 %v1759_v29 }
  0x29   : > { %1781 = vmatpush.bf16.msrb.mxu3 %v1760_v28 }
  0x2a   : > { %667 = vmatpush.bf16.msra.mxu1 %v1758_v30 }
  0x2d   : > { %1782 = vmatpush.bf16.msrb.mxu3 %v1759_v29 }
  0x31   : > { %1783 = vmatpush.bf16.msrb.mxu3 %v1758_v30 }
  0x34   : > { %1676 = vmatmul.msk.bf16.gmra.mxu0 %vm406_vm0, %v372_v10  ;;  %v384_v10 = vpack.c.bf16 %v367_v9, %v366_v8 }
  0x35   : > { %1784 = vmatpush.bf16.msra.mxu3 %v1773_v34 }
  0x36   : > { %1688 = vmatmul.msk.bf16.gmra.mxu3 %vm406_vm0, %v384_v10 }
  0x44   : > { %1677 = vmatmul.msk.bf16.gmra.mxu0 %vm406_vm0, %v373_v13 }
  0x46   : > { %1689 = vmatmul.msk.bf16.gmra.mxu3 %vm406_vm0, %v385_v23 }
  0x54   : > { %1678 = vmatmul.msk.bf16.gmra.mxu0 %vm406_vm0, %v374_v16  ;;  %v362_v16 = vld [vmem:[%s2016_s20 + $0xc0] sm:$0xff] }
  0x55   : > { %v382_v19 = vpack.c.bf16 %v363_v17, %v362_v16 }
  0x64   : > { %1679 = vmatmul.msk.bf16.gmra.mxu0 %vm406_vm0, %v375_v20 }
  0x74   : > { %1680 = vmatmul.msk.bf16.gmra.mxu0 %vm406_vm0, %v376_v27 }
  0x84   : > { %1681 = vmatmul.msk.bf16.gmra.mxu0 %vm406_vm0, %v377_v33 }
  0x91   : > { %v464_v37 = vpop.f32.mrf.mxu0 }
  0x92   : > { %v465_v39 = vadd.f32 %v2071_v38, %v464_v37 }
  0x94   : > { %1682 = vmatmul.msk.bf16.gmra.mxu0 %vm406_vm0, %v378_v36  ;;  %v544_v42 = vmax.f32 %v465_v39, 0.0  ;;  %v1772_v39 = vld [vmem:[%s2457_s5 + $0x30] sm:$0xff] }
  0x95   : > { %866 = vmatpush.bf16.msra.mxu2 %v1772_v39  ;;  %1785 = vmatpush.bf16.msra.mxu3 %v1772_v39 }
  0x99   : > { %v466_v40 = vpop.f32.mrf.mxu0 }
  0x9a   : > { %v467_v41 = vadd.f32 %v2071_v38, %v466_v40 }
  0x9c   : > { %v545_v43 = vmax.f32 %v467_v41, 0.0  ;;  %v1771_v41 = vld [vmem:[%s2457_s5 + $0x28] sm:$0xff] }
  0x9d   : > { %867 = vmatpush.bf16.msra.mxu2 %v1771_v41  ;;  %1786 = vmatpush.bf16.msra.mxu3 %v1771_v41 }
  0x9e   : > { %v576_v46 = vpack.c.bf16 %v545_v43, %v544_v42  ;;  %v1770_v42 = vld [vmem:[%s2457_s5 + $0x20] sm:$0xff] }
  0xa0   : > { %668 = vmatmul.bf16.vlgmr.msra.gmra.mxu1 %v576_v46  ;;  %v1769_v46 = vld [vmem:[%s2457_s5 + $0x18] sm:$0xff] }
  0xa1   : > { %v469_v48 = vpop.f32.mrf.mxu0  ;;  %868 = vmatpush.bf16.msra.mxu2 %v1770_v42  ;;  %1787 = vmatpush.bf16.msra.mxu3 %v1770_v42 }
  0xa2   : > { %v470_v49 = vadd.f32 %v2071_v38, %v469_v48 }
  0xa4   : > { %1683 = vmatmul.msk.bf16.gmra.mxu0 %vm406_vm0, %v379_v47  ;;  %v546_v52 = vmax.f32 %v470_v49, 0.0 }
  0xa5   : > { %869 = vmatpush.bf16.msra.mxu2 %v1769_v46  ;;  %1788 = vmatpush.bf16.msra.mxu3 %v1769_v46 }
  0xa9   : > { %v471_v50 = vpop.f32.mrf.mxu0 }
  0xaa   : > { %v472_v51 = vadd.f32 %v2071_v38, %v471_v50  ;;  %v1768_v50 = vld [vmem:[%s2457_s5 + $0x10] sm:$0xff] }
  0xab   : > { %870 = vmatpush.bf16.msra.mxu2 %v1768_v50  ;;  %1789 = vmatpush.bf16.msra.mxu3 %v1768_v50 }
  0xac   : > { %v547_v53 = vmax.f32 %v472_v51, 0.0 }
  0xae   : > { %v577_v56 = vpack.c.bf16 %v547_v53, %v546_v52  ;;  %v1767_v52 = vld [vmem:[%s2457_s5 + $0x8] sm:$0xff]  ;;  %v1766_v53 = vld [vmem:[%s2457_s5] sm:$0xff] }
  0xaf   : > { %871 = vmatpush.bf16.msra.mxu2 %v1767_v52  ;;  %1790 = vmatpush.bf16.msra.mxu3 %v1767_v52 }
  0xb0   : > { %673 = vmatmul.bf16.gmra.mxu1 %v577_v56 }
  0xb1   : > { %v474_v58 = vpop.f32.mrf.mxu0 }
  0xb2   : > { %v475_v62 = vadd.f32 %v2071_v38, %v474_v58 }
  0xb3   : > { %872 = vmatpush.bf16.msra.mxu2 %v1766_v53  ;;  %1791 = vmatpush.bf16.msra.mxu3 %v1766_v53 }
  0xb4   : > { %1684 = vmatmul.msk.bf16.gmra.mxu0 %vm406_vm0, %v380_v57  ;;  %v548_v1 = vmax.f32 %v475_v62, 0.0 }
  0xb9   : > { %v476_v63 = vpop.f32.mrf.mxu0 }
  0xba   : > { %v477_v0 = vadd.f32 %v2071_v38, %v476_v63 }
  0xbc   : > { %v549_v2 = vmax.f32 %v477_v0, 0.0 }
  0xbe   : > { %v578_v5 = vpack.c.bf16 %v549_v2, %v548_v1 }
  0xc0   : > { %678 = vmatmul.bf16.gmra.mxu1 %v578_v5 }
  0xc1   : > { %v479_v7 = vpop.f32.mrf.mxu0 }
  0xc2   : > { %v480_v11 = vadd.f32 %v2071_v38, %v479_v7 }
  0xc4   : > { %1685 = vmatmul.msk.bf16.gmra.mxu0 %vm406_vm0, %v381_v6  ;;  %v550_v14 = vmax.f32 %v480_v11, 0.0 }
  0xc9   : > { %v481_v12 = vpop.f32.mrf.mxu0 }
  0xca   : > { %v482_v13 = vadd.f32 %v2071_v38, %v481_v12 }
  0xcc   : > { %v551_v15 = vmax.f32 %v482_v13, 0.0 }
  0xce   : > { %v579_v18 = vpack.c.bf16 %v551_v15, %v550_v14 }
  0xd0   : > { %683 = vmatmul.bf16.gmra.mxu1 %v579_v18 }
  0xd1   : > { %v484_v20 = vpop.f32.mrf.mxu0 }
  0xd2   : > { %v485_v24 = vadd.f32 %v2071_v38, %v484_v20 }
  0xd4   : > { %1686 = vmatmul.msk.bf16.gmra.mxu0 %vm406_vm0, %v382_v19  ;;  %v552_v27 = vmax.f32 %v485_v24, 0.0 }
  0xd9   : > { %v486_v25 = vpop.f32.mrf.mxu0 }
  0xda   : > { %v487_v26 = vadd.f32 %v2071_v38, %v486_v25 }
  0xdc   : > { %v553_v28 = vmax.f32 %v487_v26, 0.0 }
  0xde   : > { %v580_v29 = vpack.c.bf16 %v553_v28, %v552_v27 }
  0xe0   : > { %688 = vmatmul.bf16.gmra.mxu1 %v580_v29 }
  0xe1   : > { %v489_v30 = vpop.f32.mrf.mxu0 }
  0xe2   : > { %v490_v31 = vadd.f32 %v2071_v38, %v489_v30 }
  0xe4   : > { %v554_v35 = vmax.f32 %v490_v31, 0.0 }
  0xe9   : > { %v491_v32 = vpop.f32.mrf.mxu0 }
  0xea   : > { %v492_v33 = vadd.f32 %v2071_v38, %v491_v32 }
  0xec   : > { %v555_v36 = vmax.f32 %v492_v33, 0.0 }
  0xee   : > { %v581_v37 = vpack.c.bf16 %v555_v36, %v554_v35 }
  0xf0   : > { %693 = vmatmul.bf16.gmra.mxu1 %v581_v37 }
  0xf1   : > { %v494_v40 = vpop.f32.mrf.mxu0 }
  0xf2   : > { %v495_v43 = vadd.f32 %v2071_v38, %v494_v40 }
  0xf4   : > { %v556_v47 = vmax.f32 %v495_v43, 0.0 }
  0xf9   : > { %v496_v44 = vpop.f32.mrf.mxu0 }
  0xfa   : > { %v497_v45 = vadd.f32 %v2071_v38, %v496_v44 }
  0xfc   : > { %v557_v48 = vmax.f32 %v497_v45, 0.0 }
  0xfe   : > { %v582_v49 = vpack.c.bf16 %v557_v48, %v556_v47 }
 0x100   : > { %698 = vmatmul.bf16.gmra.mxu1 %v582_v49  ;;  %v529_v49 = vpop.f32.mrf.mxu3 }
 0x101   : > { %v499_v51 = vpop.f32.mrf.mxu0 }
 0x102   : > { %v500_v54 = vadd.f32 %v2071_v38, %v499_v51 }
 0x104   : > { %v558_v57 = vmax.f32 %v500_v54, 0.0 }
 0x109   : > { %v501_v55 = vpop.f32.mrf.mxu0 }
 0x10a   : > { %v502_v56 = vadd.f32 %v2071_v38, %v501_v55 }
 0x10c   : > { %v559_v58 = vmax.f32 %v502_v56, 0.0 }
 0x10e   : > { %v583_v59 = vpack.c.bf16 %v559_v58, %v558_v57 }
 0x110   : > { %703 = vmatmul.bf16.gmra.mxu1 %v583_v59  ;;  %v531_v59 = vpop.f32.mrf.mxu3 }
 0x111   : > { %v504_v60 = vpop.f32.mrf.mxu0 }
 0x112   : > { %v505_v61 = vadd.f32 %v2071_v38, %v504_v60 }
 0x114   : > { %v560_v0 = vmax.f32 %v505_v61, 0.0 }
 0x119   : > { %v506_v62 = vpop.f32.mrf.mxu0 }
 0x11a   : > { %v507_v63 = vadd.f32 %v2071_v38, %v506_v62 }
 0x11c   : > { %v561_v1 = vmax.f32 %v507_v63, 0.0 }
 0x11d   : > { %v669_v2 = vpop.f32.mrf.mxu1 }
 0x11e   : > { %v584_v3 = vpack.c.bf16 %v561_v1, %v560_v0  ;;  %v670_v6 = vadd.f32 %v2140_v4, %v669_v2  ;;  %v534_v2 = vpop.f32.mrf.mxu3 }
 0x120   : > { %708 = vmatmul.bf16.gmra.mxu1 %v584_v3  ;;  %v749_v9 = vmax.f32 %v670_v6, 0.0  ;;  %v530_v3 = vadd.f32 %v2071_v38, %v529_v49 }
 0x121   : > { %v509_v5 = vpop.f32.mrf.mxu0 }
 0x122   : > { %v510_v10 = vadd.f32 %v2071_v38, %v509_v5  ;;  %v532_v5 = vadd.f32 %v2071_v38, %v531_v59 }
 0x124   : > { %v562_v15 = vmax.f32 %v510_v10, 0.0  ;;  %v571_v10 = vmax.f32 %v532_v5, 0.0 }
 0x125   : > { %v671_v7 = vpop.f32.mrf.mxu1 }
 0x126   : > { %v672_v8 = vadd.f32 %v2140_v4, %v671_v7 }
 0x128   : > { %v750_v11 = vmax.f32 %v672_v8, 0.0 }
 0x129   : > { %v511_v12 = vpop.f32.mrf.mxu0 }
 0x12a   : > { %v512_v13 = vadd.f32 %v2071_v38, %v511_v12  ;;  %v781_v14 = vpack.c.bf16 %v750_v11, %v749_v9  ;;  %v570_v9 = vmax.f32 %v530_v3, 0.0 }
 0x12c   : > { %v563_v16 = vmax.f32 %v512_v13, 0.0  ;;  %873 = vmatmul.bf16.vlgmr.msra.gmra.mxu2 %v781_v14  ;;  %v589_v13 = vpack.c.bf16 %v571_v10, %v570_v9  ;;  %v536_v14 = vpop.f32.mrf.mxu3 }
 0x12d   : > { %v674_v17 = vpop.f32.mrf.mxu1 }
 0x12e   : > { %v585_v18 = vpack.c.bf16 %v563_v16, %v562_v15  ;;  %v675_v20 = vadd.f32 %v2140_v4, %v674_v17  ;;  %v535_v17 = vadd.f32 %v2071_v38, %v534_v2 }
 0x130   : > { %713 = vmatmul.bf16.gmra.mxu1 %v585_v18  ;;  %v751_v23 = vmax.f32 %v675_v20, 0.0  ;;  %v537_v18 = vadd.f32 %v2071_v38, %v536_v14 }
 0x131   : > { %v514_v19 = vpop.f32.mrf.mxu0 }
 0x132   : > { %v515_v24 = vadd.f32 %v2071_v38, %v514_v19 }
 0x134   : > { %v564_v29 = vmax.f32 %v515_v24, 0.0  ;;  %v573_v24 = vmax.f32 %v537_v18, 0.0 }
 0x135   : > { %v676_v21 = vpop.f32.mrf.mxu1 }
 0x136   : > { %v677_v22 = vadd.f32 %v2140_v4, %v676_v21 }
 0x138   : > { %v752_v25 = vmax.f32 %v677_v22, 0.0  ;;  %v539_v22 = vpop.f32.mrf.mxu3 }
 0x139   : > { %v516_v26 = vpop.f32.mrf.mxu0 }
 0x13a   : > { %v517_v27 = vadd.f32 %v2071_v38, %v516_v26  ;;  %v782_v28 = vpack.c.bf16 %v752_v25, %v751_v23  ;;  %v572_v23 = vmax.f32 %v535_v17, 0.0 }
 0x13c   : > { %v565_v30 = vmax.f32 %v517_v27, 0.0  ;;  %878 = vmatmul.bf16.gmra.mxu2 %v782_v28  ;;  %v590_v27 = vpack.c.bf16 %v573_v24, %v572_v23 }
 0x13d   : > { %v679_v31 = vpop.f32.mrf.mxu1 }
 0x13e   : > { %v586_v32 = vpack.c.bf16 %v565_v30, %v564_v29  ;;  %v680_v34 = vadd.f32 %v2140_v4, %v679_v31  ;;  %v540_v31 = vadd.f32 %v2071_v38, %v539_v22 }
 0x140   : > { %718 = vmatmul.bf16.gmra.mxu1 %v586_v32  ;;  %v753_v37 = vmax.f32 %v680_v34, 0.0  ;;  %v541_v28 = vpop.f32.mrf.mxu3 }
 0x141   : > { %v519_v33 = vpop.f32.mrf.mxu0  ;;  %v542_v32 = vadd.f32 %v2071_v38, %v541_v28 }
 0x142   : > { %v520_v39 = vadd.f32 %v2071_v38, %v519_v33 }
 0x144   : > { %v566_v44 = vmax.f32 %v520_v39, 0.0 }
 0x145   : > { %v681_v35 = vpop.f32.mrf.mxu1 }
 0x146   : > { %v682_v36 = vadd.f32 %v2140_v4, %v681_v35 }
 0x148   : > { %v754_v40 = vmax.f32 %v682_v36, 0.0  ;;  %v574_v36 = vmax.f32 %v540_v31, 0.0 }
 0x149   : > { %v521_v41 = vpop.f32.mrf.mxu0 }
 0x14a   : > { %v522_v42 = vadd.f32 %v2071_v38, %v521_v41  ;;  %v783_v43 = vpack.c.bf16 %v754_v40, %v753_v37  ;;  %v575_v37 = vmax.f32 %v542_v32, 0.0 }
 0x14c   : > { %v567_v45 = vmax.f32 %v522_v42, 0.0  ;;  %883 = vmatmul.bf16.gmra.mxu2 %v783_v43  ;;  %v591_v41 = vpack.c.bf16 %v575_v37, %v574_v36 }
 0x14d   : > { %v684_v46 = vpop.f32.mrf.mxu1 }
 0x14e   : > { %v587_v47 = vpack.c.bf16 %v567_v45, %v566_v44  ;;  %v685_v50 = vadd.f32 %v2140_v4, %v684_v46 }
 0x150   : > { %723 = vmatmul.bf16.gmra.mxu1 %v587_v47  ;;  %v755_v53 = vmax.f32 %v685_v50, 0.0 }
 0x151   : > { %v524_v48 = vpop.f32.mrf.mxu0 }
 0x152   : > { %v525_v54 = vadd.f32 %v2071_v38, %v524_v48 }
 0x154   : > { %v568_v60 = vmax.f32 %v525_v54, 0.0  ;;  %v2177_v54 = vld [vmem:[%s2458_s6] ss:$0 sm:$0xff] }
 0x155   : > { %v686_v51 = vpop.f32.mrf.mxu1 }
 0x156   : > { %v687_v52 = vadd.f32 %v2140_v4, %v686_v51 }
 0x158   : > { %v756_v55 = vmax.f32 %v687_v52, 0.0 }
 0x159   : > { %v526_v56 = vpop.f32.mrf.mxu0 }
 0x15a   : > { %v527_v57 = vadd.f32 %v2071_v38, %v526_v56  ;;  %v784_v58 = vpack.c.bf16 %v756_v55, %v755_v53 }
 0x15c   : > { %v569_v61 = vmax.f32 %v527_v57, 0.0  ;;  %888 = vmatmul.bf16.gmra.mxu2 %v784_v58  ;;  %v2183_v58 = vld [vmem:[%s2459_s7] ss:$0 sm:$0xff] }
 0x15d   : > { %v689_v62 = vpop.f32.mrf.mxu1 }
 0x15e   : > { %v588_v63 = vpack.c.bf16 %v569_v61, %v568_v60  ;;  %v690_v0 = vadd.f32 %v2140_v4, %v689_v62 }
 0x160   : > { %728 = vmatmul.bf16.vlgmr.msrb.gmra.mxu3 %v588_v63  ;;  %v757_v7 = vmax.f32 %v690_v0, 0.0 }
 0x165   : > { %v691_v1 = vpop.f32.mrf.mxu1 }
 0x166   : > { %v692_v6 = vadd.f32 %v2140_v4, %v691_v1 }
 0x168   : > { %v758_v8 = vmax.f32 %v692_v6, 0.0 }
 0x16a   : > { %v785_v11 = vpack.c.bf16 %v758_v8, %v757_v7 }
 0x16c   : > { %893 = vmatmul.bf16.gmra.mxu2 %v785_v11 }
 0x16d   : > { %v694_v12 = vpop.f32.mrf.mxu1 }
 0x16e   : > { %v695_v15 = vadd.f32 %v2140_v4, %v694_v12 }
 0x170   : > { %733 = vmatmul.bf16.gmra.mxu3 %v589_v13  ;;  %v759_v20 = vmax.f32 %v695_v15, 0.0 }
 0x175   : > { %v696_v16 = vpop.f32.mrf.mxu1 }
 0x176   : > { %v697_v19 = vadd.f32 %v2140_v4, %v696_v16 }
 0x178   : > { %v760_v21 = vmax.f32 %v697_v19, 0.0 }
 0x17a   : > { %v786_v25 = vpack.c.bf16 %v760_v21, %v759_v20 }
 0x17c   : > { %898 = vmatmul.bf16.gmra.mxu2 %v786_v25 }
 0x17d   : > { %v699_v26 = vpop.f32.mrf.mxu1 }
 0x17e   : > { %v700_v29 = vadd.f32 %v2140_v4, %v699_v26 }
 0x180   : > { %738 = vmatmul.bf16.gmra.mxu3 %v590_v27  ;;  %v761_v34 = vmax.f32 %v700_v29, 0.0 }
 0x185   : > { %v701_v30 = vpop.f32.mrf.mxu1 }
 0x186   : > { %v702_v33 = vadd.f32 %v2140_v4, %v701_v30 }
 0x188   : > { %v762_v35 = vmax.f32 %v702_v33, 0.0 }
 0x18a   : > { %v787_v39 = vpack.c.bf16 %v762_v35, %v761_v34 }
 0x18c   : > { %903 = vmatmul.bf16.gmra.mxu2 %v787_v39 }
 0x18d   : > { %v704_v40 = vpop.f32.mrf.mxu1 }
 0x18e   : > { %v705_v42 = vadd.f32 %v2140_v4, %v704_v40 }
 0x190   : > { %743 = vmatmul.bf16.gmra.mxu3 %v591_v41  ;;  %v763_v45 = vmax.f32 %v705_v42, 0.0 }
 0x195   : > { %v706_v43 = vpop.f32.mrf.mxu1 }
 0x196   : > { %v707_v44 = vadd.f32 %v2140_v4, %v706_v43 }
 0x198   : > { %v764_v46 = vmax.f32 %v707_v44, 0.0 }
 0x19a   : > { %v788_v47 = vpack.c.bf16 %v764_v46, %v763_v45 }
 0x19c   : > { %908 = vmatmul.bf16.gmra.mxu2 %v788_v47 }
 0x19d   : > { %v709_v38 = vpop.f32.mrf.mxu1 }
 0x19e   : > { %v710_v48 = vadd.f32 %v2140_v4, %v709_v38 }
 0x1a0   : > { %v765_v51 = vmax.f32 %v710_v48, 0.0 }
 0x1a5   : > { %v711_v49 = vpop.f32.mrf.mxu1 }
 0x1a6   : > { %v712_v50 = vadd.f32 %v2140_v4, %v711_v49 }
 0x1a8   : > { %v766_v52 = vmax.f32 %v712_v50, 0.0 }
 0x1aa   : > { %v789_v53 = vpack.c.bf16 %v766_v52, %v765_v51 }
 0x1ac   : > { %913 = vmatmul.bf16.gmra.mxu2 %v789_v53 }
 0x1ad   : > { %v714_v55 = vpop.f32.mrf.mxu1 }
 0x1ae   : > { %v715_v60 = vadd.f32 %v2140_v4, %v714_v55 }
 0x1af   : > { %v874_v56 = vpop.f32.mrf.mxu2 }
 0x1b0   : > { %v875_v57 = vadd.f32 %v2177_v54, %v874_v56  ;;  %v767_v1 = vmax.f32 %v715_v60, 0.0 }
 0x1b2   : > { %v954_v59 = vmax.f32 %v875_v57, 0.0 }
 0x1b4   : > { %v990_v61 = vmul.f32 %v2183_v58, %v954_v59 }
 0x1b5   : > { %v716_v62 = vpop.f32.mrf.mxu1 }
 0x1b6   : > { %v717_v63 = vadd.f32 %v2140_v4, %v716_v62  ;;  %1022 = vadd.xlane.f32.xlu0 %v990_v61 }
 0x1b7   : > { %v876_v0 = vpop.f32.mrf.mxu2 }
 0x1b8   : > { %v768_v2 = vmax.f32 %v717_v63, 0.0  ;;  %v877_v3 = vadd.f32 %v2177_v54, %v876_v0 }
 0x1ba   : > { %v955_v5 = vmax.f32 %v877_v3, 0.0  ;;  %v790_v6 = vpack.c.bf16 %v768_v2, %v767_v1 }
 0x1bc   : > { %918 = vmatmul.bf16.gmra.mxu2 %v790_v6  ;;  %v991_v7 = vmul.f32 %v2183_v58, %v955_v5 }
 0x1bd   : > { %v719_v8 = vpop.f32.mrf.mxu1 }
 0x1be   : > { %1024 = vadd.xlane.f32.xlu0 %v991_v7  ;;  %v720_v12 = vadd.f32 %v2140_v4, %v719_v8 }
 0x1bf   : > { %v879_v9 = vpop.f32.mrf.mxu2 }
 0x1c0   : > { %v880_v10 = vadd.f32 %v2177_v54, %v879_v9  ;;  %v769_v17 = vmax.f32 %v720_v12, 0.0 }
 0x1c2   : > { %v956_v11 = vmax.f32 %v880_v10, 0.0 }
 0x1c4   : > { %v992_v13 = vmul.f32 %v2183_v58, %v956_v11 }
 0x1c5   : > { %v721_v14 = vpop.f32.mrf.mxu1 }
 0x1c6   : > { %v722_v15 = vadd.f32 %v2140_v4, %v721_v14  ;;  %1026 = vadd.xlane.f32.xlu1 %v992_v13 }
 0x1c7   : > { %v881_v16 = vpop.f32.mrf.mxu2 }
 0x1c8   : > { %v770_v18 = vmax.f32 %v722_v15, 0.0  ;;  %v882_v19 = vadd.f32 %v2177_v54, %v881_v16 }
 0x1ca   : > { %v957_v20 = vmax.f32 %v882_v19, 0.0  ;;  %v791_v21 = vpack.c.bf16 %v770_v18, %v769_v17 }
 0x1cc   : > { %923 = vmatmul.bf16.gmra.mxu2 %v791_v21  ;;  %v993_v22 = vmul.f32 %v2183_v58, %v957_v20 }
 0x1cd   : > { %v724_v23 = vpop.f32.mrf.mxu1 }
 0x1ce   : > { %1028 = vadd.xlane.f32.xlu1 %v993_v22  ;;  %v725_v27 = vadd.f32 %v2140_v4, %v724_v23 }
 0x1cf   : > { %v884_v24 = vpop.f32.mrf.mxu2 }
 0x1d0   : > { %v885_v25 = vadd.f32 %v2177_v54, %v884_v24  ;;  %v771_v32 = vmax.f32 %v725_v27, 0.0 }
 0x1d2   : > { %v958_v26 = vmax.f32 %v885_v25, 0.0 }
 0x1d4   : > { %v994_v28 = vmul.f32 %v2183_v58, %v958_v26 }
 0x1d5   : > { %v726_v29 = vpop.f32.mrf.mxu1 }
 0x1d6   : > { %v727_v30 = vadd.f32 %v2140_v4, %v726_v29  ;;  %1030 = vadd.xlane.f32.xlu2 %v994_v28 }
 0x1d7   : > { %v886_v31 = vpop.f32.mrf.mxu2 }
 0x1d8   : > { %v772_v33 = vmax.f32 %v727_v30, 0.0  ;;  %v887_v34 = vadd.f32 %v2177_v54, %v886_v31 }
 0x1da   : > { %v959_v35 = vmax.f32 %v887_v34, 0.0  ;;  %v792_v36 = vpack.c.bf16 %v772_v33, %v771_v32 }
 0x1dc   : > { %928 = vmatmul.bf16.gmra.mxu2 %v792_v36  ;;  %v995_v37 = vmul.f32 %v2183_v58, %v959_v35 }
 0x1de   : > { %1032 = vadd.xlane.f32.xlu2 %v995_v37 }
 0x1df   : > { %v889_v39 = vpop.f32.mrf.mxu2 }
 0x1e0   : > { %v890_v40 = vadd.f32 %v2177_v54, %v889_v39 }
 0x1e2   : > { %v960_v41 = vmax.f32 %v890_v40, 0.0 }
 0x1e3   : > { %v729_v42 = vpop.f32.mrf.mxu3 }
 0x1e4   : > { %v996_v43 = vmul.f32 %v2183_v58, %v960_v41  ;;  %v730_v46 = vadd.f32 %v2140_v4, %v729_v42 }
 0x1e6   : > { %1034 = vadd.xlane.f32.xlu0 %v996_v43  ;;  %v773_v50 = vmax.f32 %v730_v46, 0.0  ;;  %v2228_v43 = vstv %s1086_s23 }
 0x1e7   : > { %v891_v44 = vpop.f32.mrf.mxu2 }
 0x1e8   : > { %v892_v45 = vadd.f32 %v2177_v54, %v891_v44 }
 0x1ea   : > { %v961_v47 = vmax.f32 %v892_v45, 0.0 }
 0x1eb   : > { %v731_v38 = vpop.f32.mrf.mxu3 }
 0x1ec   : > { %v732_v48 = vadd.f32 %v2140_v4, %v731_v38  ;;  %v997_v49 = vmul.f32 %v2183_v58, %v961_v47 }
 0x1ee   : > { %v774_v51 = vmax.f32 %v732_v48, 0.0  ;;  %1036 = vadd.xlane.f32.xlu1 %v997_v49 }
 0x1ef   : > { %v894_v52 = vpop.f32.mrf.mxu2 }
 0x1f0   : > { %v793_v53 = vpack.c.bf16 %v774_v51, %v773_v50  ;;  %v895_v55 = vadd.f32 %v2177_v54, %v894_v52 }
 0x1f2   : > { %v962_v56 = vmax.f32 %v895_v55, 0.0  ;;  %933 = vmatmul.bf16.vlgmr.msra.gmra.mxu3 %v793_v53 }
 0x1f3   : > { %v734_v57 = vpop.f32.mrf.mxu3 }
 0x1f4   : > { %v998_v59 = vmul.f32 %v2183_v58, %v962_v56  ;;  %v735_v62 = vadd.f32 %v2140_v4, %v734_v57 }
 0x1f6   : > { %1038 = vadd.xlane.f32.xlu2 %v998_v59  ;;  %v775_v3 = vmax.f32 %v735_v62, 0.0 }
 0x1f7   : > { %v896_v60 = vpop.f32.mrf.mxu2 }
 0x1f8   : > { %v897_v61 = vadd.f32 %v2177_v54, %v896_v60 }
 0x1fa   : > { %v963_v63 = vmax.f32 %v897_v61, 0.0 }
 0x1fb   : > { %v736_v0 = vpop.f32.mrf.mxu3 }
 0x1fc   : > { %v737_v1 = vadd.f32 %v2140_v4, %v736_v0  ;;  %v999_v2 = vmul.f32 %v2183_v58, %v963_v63 }
 0x1fe   : > { %v776_v5 = vmax.f32 %v737_v1, 0.0  ;;  %1040 = vadd.xlane.f32.xlu0 %v999_v2 }
 0x1ff   : > { %v899_v6 = vpop.f32.mrf.mxu2 }
 0x200   : > { %v900_v7 = vadd.f32 %v2177_v54, %v899_v6  ;;  %v794_v8 = vpack.c.bf16 %v776_v5, %v775_v3 }
 0x202   : > { %v964_v9 = vmax.f32 %v900_v7, 0.0  ;;  %938 = vmatmul.bf16.gmra.mxu3 %v794_v8 }
 0x203   : > { %v739_v10 = vpop.f32.mrf.mxu3 }
 0x204   : > { %v1000_v11 = vmul.f32 %v2183_v58, %v964_v9  ;;  %v740_v14 = vadd.f32 %v2140_v4, %v739_v10 }
 0x206   : > { %1042 = vadd.xlane.f32.xlu1 %v1000_v11  ;;  %v777_v19 = vmax.f32 %v740_v14, 0.0 }
 0x207   : > { %v901_v12 = vpop.f32.mrf.mxu2 }
 0x208   : > { %v902_v13 = vadd.f32 %v2177_v54, %v901_v12 }
 0x20a   : > { %v965_v15 = vmax.f32 %v902_v13, 0.0 }
 0x20b   : > { %v741_v16 = vpop.f32.mrf.mxu3 }
 0x20c   : > { %v742_v17 = vadd.f32 %v2140_v4, %v741_v16  ;;  %v1001_v18 = vmul.f32 %v2183_v58, %v965_v15 }
 0x20e   : > { %v778_v20 = vmax.f32 %v742_v17, 0.0  ;;  %1044 = vadd.xlane.f32.xlu2 %v1001_v18 }
 0x20f   : > { %v904_v21 = vpop.f32.mrf.mxu2 }
 0x210   : > { %v905_v22 = vadd.f32 %v2177_v54, %v904_v21  ;;  %v795_v23 = vpack.c.bf16 %v778_v20, %v777_v19 }
 0x212   : > { %v966_v24 = vmax.f32 %v905_v22, 0.0  ;;  %943 = vmatmul.bf16.gmra.mxu3 %v795_v23 }
 0x213   : > { %v744_v25 = vpop.f32.mrf.mxu3 }
 0x214   : > { %v1002_v26 = vmul.f32 %v2183_v58, %v966_v24  ;;  %v745_v29 = vadd.f32 %v2140_v4, %v744_v25 }
 0x216   : > { %1046 = vadd.xlane.f32.xlu0 %v1002_v26  ;;  %v779_v34 = vmax.f32 %v745_v29, 0.0 }
 0x217   : > { %v906_v27 = vpop.f32.mrf.mxu2 }
 0x218   : > { %v907_v28 = vadd.f32 %v2177_v54, %v906_v27 }
 0x21a   : > { %v967_v30 = vmax.f32 %v907_v28, 0.0 }
 0x21b   : > { %v746_v31 = vpop.f32.mrf.mxu3 }
 0x21c   : > { %v747_v32 = vadd.f32 %v2140_v4, %v746_v31  ;;  %v1003_v33 = vmul.f32 %v2183_v58, %v967_v30 }
 0x21e   : > { %v780_v35 = vmax.f32 %v747_v32, 0.0  ;;  %1048 = vadd.xlane.f32.xlu1 %v1003_v33 }
 0x21f   : > { %v909_v36 = vpop.f32.mrf.mxu2 }
 0x220   : > { %v910_v37 = vadd.f32 %v2177_v54, %v909_v36  ;;  %v796_v39 = vpack.c.bf16 %v780_v35, %v779_v34 }
 0x222   : > { %v968_v40 = vmax.f32 %v910_v37, 0.0  ;;  %948 = vmatmul.bf16.gmra.mxu3 %v796_v39 }
 0x224   : > { %v1004_v41 = vmul.f32 %v2183_v58, %v968_v40 }
 0x226   : > { %1050 = vadd.xlane.f32.xlu2 %v1004_v41 }
 0x227   : > { %v911_v42 = vpop.f32.mrf.mxu2 }
 0x228   : > { %v912_v4 = vadd.f32 %v2177_v54, %v911_v42 }
 0x229   : > { %v1023_v44 = vpop.xlane.xlu0 %1022 }
 0x22a   : > { %v969_v45 = vmax.f32 %v912_v4, 0.0  ;;  %v1088_v46 = vadd.f32 %v2228_v43, %v1023_v44 }
 0x22c   : > { %v1152_v47 = vmin.f32 %v1088_v46, 20.0  ;;  %v1005_v38 = vmul.f32 %v2183_v58, %v969_v45  ;;  %vm1120_vm3 = vcmp.gt.f32.partialorder %v1088_v46, 20.0 }
 0x22e   : > { %v1184_v48 = vmul.f32 1.442695, %v1152_v47  ;;  %1052 = vadd.xlane.f32.xlu0 %v1005_v38 }
 0x22f   : > { %v914_v49 = vpop.f32.mrf.mxu2 }
 0x230   : > { %1804 = vpow2.f32 %v1184_v48  ;;  %v915_v50 = vadd.f32 %v2177_v54, %v914_v49 }
 0x231   : > { %v1025_v51 = vpop.xlane.xlu0 %1024 }
 0x232   : > { %v970_v52 = vmax.f32 %v915_v50, 0.0  ;;  %v2235_v53 = vadd.f32 %v2228_v43, %v1025_v51 }
 0x234   : > { %v1153_v55 = vmin.f32 %v2235_v53, 20.0  ;;  %v1006_v56 = vmul.f32 %v2183_v58, %v970_v52  ;;  %vm1121_vm5 = vcmp.gt.f32.partialorder %v2235_v53, 20.0 }
 0x236   : > { %v1805_v57 = vpop.eup %1804  ;;  %v1186_v59 = vmul.f32 1.442695, %v1153_v55  ;;  %1054 = vadd.xlane.f32.xlu1 %v1006_v56 }
 0x237   : > { %v1248_v60 = vadd.f32 1.0, %v1805_v57  ;;  %v916_v61 = vpop.f32.mrf.mxu2  ;;  %v1251_v62 = vmul.f32 -0.5, %v1805_v57  ;;  %v1254_v7 = vand.u32 2147483647, %v1805_v57 }
 0x238   : > { %1806 = vpow2.f32 %v1186_v59  ;;  %v917_v63 = vadd.f32 %v2177_v54, %v916_v61 }
 0x239   : > { %1808 = vlog2.f32 %v1248_v60  ;;  %v1027_v0 = vpop.xlane.xlu1 %1026  ;;  %v1252_v3 = vadd.f32 1.0, %v1251_v62  ;;  %vm1255_vm2 = vcmp.lt.f32.partialorder %v1254_v7, 0.0004427343 }
 0x23a   : > { %v971_v1 = vmax.f32 %v917_v63, 0.0  ;;  %v2241_v2 = vadd.f32 %v2228_v43, %v1027_v0 }
 0x23b   : > { %v1253_v15 = vmul.f32 %v1805_v57, %v1252_v3 }
 0x23c   : > { %v1154_v5 = vmin.f32 %v2241_v2, 20.0  ;;  %v1007_v6 = vmul.f32 %v2183_v58, %v971_v1  ;;  %vm1122_vm7 = vcmp.gt.f32.partialorder %v2241_v2, 20.0 }
 0x23e   : > { %v1807_v8 = vpop.eup %1806  ;;  %v1188_v9 = vmul.f32 1.442695, %v1154_v5  ;;  %1056 = vadd.xlane.f32.xlu2 %v1007_v6 }
 0x23f   : > { %v1809_v10 = vpop.eup %1808  ;;  %v1257_v11 = vadd.f32 1.0, %v1807_v8  ;;  %v1260_v12 = vmul.f32 -0.5, %v1807_v8  ;;  %v919_v13 = vpop.f32.mrf.mxu2  ;;  %v1263_v25 = vand.u32 2147483647, %v1807_v8 }
 0x240   : > { %v1250_v14 = vmul.f32 0.6931472, %v1809_v10  ;;  %1810 = vpow2.f32 %v1188_v9  ;;  %v920_v16 = vadd.f32 %v2177_v54, %v919_v13 }
 0x241   : > { %1812 = vlog2.f32 %v1257_v11  ;;  %v1029_v17 = vpop.xlane.xlu1 %1028  ;;  %v1261_v22 = vadd.f32 1.0, %v1260_v12  ;;  %vm1264_vm4 = vcmp.lt.f32.partialorder %v1263_v25, 0.0004427343 }
 0x242   : > { %v1256_v18 = vsel %vm1255_vm2, %v1253_v15, %v1250_v14  ;;  %v972_v19 = vmax.f32 %v920_v16, 0.0  ;;  %v2254_v20 = vadd.f32 %v2228_v43, %v1029_v17 }
 0x243   : > { %v1536_v21 = vsel %vm1120_vm3, %v1088_v46, %v1256_v18  ;;  %v1262_v29 = vmul.f32 %v1807_v8, %v1261_v22 }
 0x244   : > { %1569 = vst.msk [vmem:[%s2251_s26] sm:$0xff] %vm1568_vm1, %v1536_v21  ;;  %v1155_v23 = vmin.f32 %v2254_v20, 20.0  ;;  %v1008_v24 = vmul.f32 %v2183_v58, %v972_v19  ;;  %vm1123_vm9 = vcmp.gt.f32.partialorder %v2254_v20, 20.0 }
 0x246   : > { %v1811_v26 = vpop.eup %1810  ;;  %v1190_v27 = vmul.f32 1.442695, %v1155_v23  ;;  %1058 = vadd.xlane.f32.xlu0 %v1008_v24 }
 0x247   : > { %v1813_v28 = vpop.eup %1812  ;;  %v1266_v30 = vadd.f32 1.0, %v1811_v26  ;;  %v921_v31 = vpop.f32.mrf.mxu2  ;;  %v1269_v33 = vmul.f32 -0.5, %v1811_v26  ;;  %v1272_v44 = vand.u32 2147483647, %v1811_v26 }
 0x248   : > { %v1259_v32 = vmul.f32 0.6931472, %v1813_v28  ;;  %1814 = vpow2.f32 %v1190_v27  ;;  %v922_v34 = vadd.f32 %v2177_v54, %v921_v31 }
 0x249   : > { %1816 = vlog2.f32 %v1266_v30  ;;  %v1031_v35 = vpop.xlane.xlu2 %1030  ;;  %v1270_v41 = vadd.f32 1.0, %v1269_v33  ;;  %vm1273_vm6 = vcmp.lt.f32.partialorder %v1272_v44, 0.0004427343 }
 0x24a   : > { %v1265_v36 = vsel %vm1264_vm4, %v1262_v29, %v1259_v32  ;;  %v973_v37 = vmax.f32 %v922_v34, 0.0  ;;  %v2263_v39 = vadd.f32 %v2228_v43, %v1031_v35 }
 0x24b   : > { %v1537_v40 = vsel %vm1121_vm5, %v2235_v53, %v1265_v36  ;;  %v1271_v51 = vmul.f32 %v1811_v26, %v1270_v41 }
 0x24c   : > { %1570 = vst.msk [vmem:[%s2251_s26 + $0x8] sm:$0xff] %vm1568_vm1, %v1537_v40  ;;  %v1156_v42 = vmin.f32 %v2263_v39, 20.0  ;;  %v1009_v4 = vmul.f32 %v2183_v58, %v973_v37  ;;  %vm1124_vm11 = vcmp.gt.f32.partialorder %v2263_v39, 20.0 }
 0x24e   : > { %v1815_v45 = vpop.eup %1814  ;;  %v1192_v46 = vmul.f32 1.442695, %v1156_v42  ;;  %1060 = vadd.xlane.f32.xlu1 %v1009_v4 }
 0x24f   : > { %v1817_v47 = vpop.eup %1816  ;;  %v1275_v38 = vadd.f32 1.0, %v1815_v45  ;;  %v1278_v48 = vmul.f32 -0.5, %v1815_v45  ;;  %v924_v49 = vpop.f32.mrf.mxu2  ;;  %v1281_v63 = vand.u32 2147483647, %v1815_v45 }
 0x250   : > { %v1268_v50 = vmul.f32 0.6931472, %v1817_v47  ;;  %1818 = vpow2.f32 %v1192_v46  ;;  %v925_v52 = vadd.f32 %v2177_v54, %v924_v49 }
 0x251   : > { %1820 = vlog2.f32 %v1275_v38  ;;  %v1033_v53 = vpop.xlane.xlu2 %1032  ;;  %v1279_v60 = vadd.f32 1.0, %v1278_v48  ;;  %vm1282_vm8 = vcmp.lt.f32.partialorder %v1281_v63, 0.0004427343 }
 0x252   : > { %v1274_v55 = vsel %vm1273_vm6, %v1271_v51, %v1268_v50  ;;  %v974_v56 = vmax.f32 %v925_v52, 0.0  ;;  %v2273_v57 = vadd.f32 %v2228_v43, %v1033_v53 }
 0x253   : > { %v1538_v59 = vsel %vm1122_vm7, %v2241_v2, %v1274_v55  ;;  %v1280_v5 = vmul.f32 %v1815_v45, %v1279_v60 }
 0x254   : > { %1571 = vst.msk [vmem:[%s2251_s26 + $0x10] sm:$0xff] %vm1568_vm1, %v1538_v59  ;;  %v1157_v61 = vmin.f32 %v2273_v57, 20.0  ;;  %v1010_v62 = vmul.f32 %v2183_v58, %v974_v56  ;;  %vm1125_vm13 = vcmp.gt.f32.partialorder %v2273_v57, 20.0 }
 0x256   : > { %v1819_v0 = vpop.eup %1818  ;;  %v1194_v1 = vmul.f32 1.442695, %v1157_v61  ;;  %1062 = vadd.xlane.f32.xlu2 %v1010_v62 }
 0x257   : > { %v1821_v3 = vpop.eup %1820  ;;  %v1284_v6 = vadd.f32 1.0, %v1819_v0  ;;  %v926_v7 = vpop.f32.mrf.mxu2  ;;  %v1287_v9 = vmul.f32 -0.5, %v1819_v0  ;;  %v1290_v18 = vand.u32 2147483647, %v1819_v0 }
 0x258   : > { %v1277_v8 = vmul.f32 0.6931472, %v1821_v3  ;;  %1822 = vpow2.f32 %v1194_v1  ;;  %v927_v2 = vadd.f32 %v2177_v54, %v926_v7 }
 0x259   : > { %1824 = vlog2.f32 %v1284_v6  ;;  %v1035_v10 = vpop.xlane.xlu0 %1034  ;;  %v1288_v15 = vadd.f32 1.0, %v1287_v9  ;;  %vm1291_vm10 = vcmp.lt.f32.partialorder %v1290_v18, 0.0004427343 }
 0x25a   : > { %v1283_v11 = vsel %vm1282_vm8, %v1280_v5, %v1277_v8  ;;  %v975_v12 = vmax.f32 %v927_v2, 0.0  ;;  %v2283_v13 = vadd.f32 %v2228_v43, %v1035_v10 }
 0x25b   : > { %v1539_v14 = vsel %vm1123_vm9, %v2254_v20, %v1283_v11  ;;  %v1289_v27 = vmul.f32 %v1819_v0, %v1288_v15 }
 0x25c   : > { %1572 = vst.msk [vmem:[%s2251_s26 + $0x18] sm:$0xff] %vm1568_vm1, %v1539_v14  ;;  %v1158_v16 = vmin.f32 %v2283_v13, 20.0  ;;  %v1011_v17 = vmul.f32 %v2183_v58, %v975_v12  ;;  %vm1126_vm15 = vcmp.gt.f32.partialorder %v2283_v13, 20.0 }
 0x25e   : > { %v1823_v19 = vpop.eup %1822  ;;  %v1196_v21 = vmul.f32 1.442695, %v1158_v16  ;;  %1064 = vadd.xlane.f32.xlu0 %v1011_v17 }
 0x25f   : > { %v1825_v22 = vpop.eup %1824  ;;  %v1293_v23 = vadd.f32 1.0, %v1823_v19  ;;  %v1296_v24 = vmul.f32 -0.5, %v1823_v19  ;;  %v929_v25 = vpop.f32.mrf.mxu2  ;;  %v1299_v36 = vand.u32 2147483647, %v1823_v19 }
 0x260   : > { %v1286_v26 = vmul.f32 0.6931472, %v1825_v22  ;;  %1826 = vpow2.f32 %v1196_v21  ;;  %v930_v20 = vadd.f32 %v2177_v54, %v929_v25 }
 0x261   : > { %1828 = vlog2.f32 %v1293_v23  ;;  %v1037_v28 = vpop.xlane.xlu1 %1036  ;;  %v1297_v33 = vadd.f32 1.0, %v1296_v24  ;;  %vm1300_vm12 = vcmp.lt.f32.partialorder %v1299_v36, 0.0004427343 }
 0x262   : > { %v1292_v29 = vsel %vm1291_vm10, %v1289_v27, %v1286_v26  ;;  %v976_v30 = vmax.f32 %v930_v20, 0.0  ;;  %v2293_v31 = vadd.f32 %v2228_v43, %v1037_v28 }
 0x263   : > { %v1540_v32 = vsel %vm1124_vm11, %v2263_v39, %v1292_v29  ;;  %v1298_v42 = vmul.f32 %v1823_v19, %v1297_v33 }
 0x264   : > { %1573 = vst.msk [vmem:[%s2251_s26 + $0x20] sm:$0xff] %vm1568_vm1, %v1540_v32  ;;  %v1159_v34 = vmin.f32 %v2293_v31, 20.0  ;;  %v1012_v35 = vmul.f32 %v2183_v58, %v976_v30  ;;  %vm1127_vm2 = vcmp.gt.f32.partialorder %v2293_v31, 20.0 }
 0x266   : > { %v1827_v37 = vpop.eup %1826  ;;  %v1198_v40 = vmul.f32 1.442695, %v1159_v34  ;;  %1066 = vadd.xlane.f32.xlu1 %v1012_v35 }
 0x267   : > { %v1829_v41 = vpop.eup %1828  ;;  %v1302_v4 = vadd.f32 1.0, %v1827_v37  ;;  %v931_v44 = vpop.f32.mrf.mxu2  ;;  %v1305_v46 = vmul.f32 -0.5, %v1827_v37  ;;  %v1308_v55 = vand.u32 2147483647, %v1827_v37 }
 0x268   : > { %v1295_v45 = vmul.f32 0.6931472, %v1829_v41  ;;  %1830 = vpow2.f32 %v1198_v40  ;;  %v932_v39 = vadd.f32 %v2177_v54, %v931_v44 }
 0x269   : > { %1832 = vlog2.f32 %v1302_v4  ;;  %v1039_v47 = vpop.xlane.xlu2 %1038  ;;  %v1306_v51 = vadd.f32 1.0, %v1305_v46  ;;  %vm1309_vm14 = vcmp.lt.f32.partialorder %v1308_v55, 0.0004427343 }
 0x26a   : > { %v1301_v38 = vsel %vm1300_vm12, %v1298_v42, %v1295_v45  ;;  %v977_v48 = vmax.f32 %v932_v39, 0.0  ;;  %v2303_v49 = vadd.f32 %v2228_v43, %v1039_v47 }
 0x26b   : > { %v1541_v50 = vsel %vm1125_vm13, %v2273_v57, %v1301_v38  ;;  %v1307_v63 = vmul.f32 %v1827_v37, %v1306_v51 }
 0x26c   : > { %1574 = vst.msk [vmem:[%s2251_s26 + $0x28] sm:$0xff] %vm1568_vm1, %v1541_v50  ;;  %v1160_v52 = vmin.f32 %v2303_v49, 20.0  ;;  %v1013_v53 = vmul.f32 %v2183_v58, %v977_v48  ;;  %vm1128_vm4 = vcmp.gt.f32.partialorder %v2303_v49, 20.0 }
 0x26e   : > { %v1831_v56 = vpop.eup %1830  ;;  %v1200_v59 = vmul.f32 1.442695, %v1160_v52  ;;  %1068 = vadd.xlane.f32.xlu2 %v1013_v53 }
 0x26f   : > { %v1833_v60 = vpop.eup %1832  ;;  %v1311_v61 = vadd.f32 1.0, %v1831_v56  ;;  %v1314_v0 = vmul.f32 -0.5, %v1831_v56  ;;  %v1317_v8 = vand.u32 2147483647, %v1831_v56 }
 0x270   : > { %v1304_v62 = vmul.f32 0.6931472, %v1833_v60  ;;  %1834 = vpow2.f32 %v1200_v59 }
 0x271   : > { %1836 = vlog2.f32 %v1311_v61  ;;  %v1041_v57 = vpop.xlane.xlu0 %1040  ;;  %v1315_v6 = vadd.f32 1.0, %v1314_v0  ;;  %vm1318_vm0 = vcmp.lt.f32.partialorder %v1317_v8, 0.0004427343 }
 0x272   : > { %v1310_v1 = vsel %vm1309_vm14, %v1307_v63, %v1304_v62  ;;  %v2312_v3 = vadd.f32 %v2228_v43, %v1041_v57 }
 0x273   : > { %v1542_v5 = vsel %vm1126_vm15, %v2283_v13, %v1310_v1  ;;  %v1316_v17 = vmul.f32 %v1831_v56, %v1315_v6 }
 0x274   : > { %1575 = vst.msk [vmem:[%s2251_s26 + $0x30] sm:$0xff] %vm1568_vm1, %v1542_v5  ;;  %v1161_v7 = vmin.f32 %v2312_v3, 20.0  ;;  %vm1129_vm6 = vcmp.gt.f32.partialorder %v2312_v3, 20.0 }
 0x275   : > { %v934_v9 = vpop.f32.mrf.mxu3 }
 0x276   : > { %v1835_v2 = vpop.eup %1834  ;;  %v1202_v10 = vmul.f32 1.442695, %v1161_v7  ;;  %v935_v11 = vadd.f32 %v2177_v54, %v934_v9 }
 0x277   : > { %v1837_v12 = vpop.eup %1836  ;;  %v1320_v14 = vadd.f32 1.0, %v1835_v2  ;;  %v1323_v15 = vmul.f32 -0.5, %v1835_v2  ;;  %v1326_v26 = vand.u32 2147483647, %v1835_v2 }
 0x278   : > { %v1313_v16 = vmul.f32 0.6931472, %v1837_v12  ;;  %1838 = vpow2.f32 %v1202_v10  ;;  %v978_v18 = vmax.f32 %v935_v11, 0.0 }
 0x279   : > { %1840 = vlog2.f32 %v1320_v14  ;;  %v1043_v13 = vpop.xlane.xlu1 %1042  ;;  %v1324_v24 = vadd.f32 1.0, %v1323_v15  ;;  %vm1327_vm3 = vcmp.lt.f32.partialorder %v1326_v26, 0.0004427343 }
 0x27a   : > { %v1319_v19 = vsel %vm1318_vm0, %v1316_v17, %v1313_v16  ;;  %v2321_v21 = vadd.f32 %v2228_v43, %v1043_v13  ;;  %v1014_v22 = vmul.f32 %v2183_v58, %v978_v18 }
 0x27b   : > { %v1543_v23 = vsel %vm1127_vm2, %v2293_v31, %v1319_v19  ;;  %v1325_v32 = vmul.f32 %v1835_v2, %v1324_v24 }
 0x27c   : > { %1576 = vst.msk [vmem:[%s2251_s26 + $0x38] sm:$0xff] %vm1568_vm1, %v1543_v23  ;;  %v1162_v25 = vmin.f32 %v2321_v21, 20.0  ;;  %1070 = vadd.xlane.f32.xlu0 %v1014_v22  ;;  %vm1130_vm8 = vcmp.gt.f32.partialorder %v2321_v21, 20.0 }
 0x27d   : > { %v936_v27 = vpop.f32.mrf.mxu3 }
 0x27e   : > { %v1839_v20 = vpop.eup %1838  ;;  %v1204_v28 = vmul.f32 1.442695, %v1162_v25  ;;  %v937_v29 = vadd.f32 %v2177_v54, %v936_v27 }
 0x27f   : > { %v1841_v30 = vpop.eup %1840  ;;  %v1329_v33 = vadd.f32 1.0, %v1839_v20  ;;  %v1332_v35 = vmul.f32 -0.5, %v1839_v20  ;;  %v1335_v45 = vand.u32 2147483647, %v1839_v20 }
 0x280   : > { %v1322_v34 = vmul.f32 0.6931472, %v1841_v30  ;;  %1842 = vpow2.f32 %v1204_v28  ;;  %v979_v31 = vmax.f32 %v937_v29, 0.0 }
 0x281   : > { %1844 = vlog2.f32 %v1329_v33  ;;  %v1045_v36 = vpop.xlane.xlu2 %1044  ;;  %v1333_v4 = vadd.f32 1.0, %v1332_v35  ;;  %vm1336_vm5 = vcmp.lt.f32.partialorder %v1335_v45, 0.0004427343 }
 0x282   : > { %v1328_v37 = vsel %vm1327_vm3, %v1325_v32, %v1322_v34  ;;  %v2331_v40 = vadd.f32 %v2228_v43, %v1045_v36  ;;  %v1015_v41 = vmul.f32 %v2183_v58, %v979_v31 }
 0x283   : > { %v1544_v42 = vsel %vm1128_vm4, %v2303_v49, %v1328_v37  ;;  %v1334_v53 = vmul.f32 %v1839_v20, %v1333_v4 }
 0x284   : > { %1577 = vst.msk [vmem:[%s2251_s26 + $0x40] sm:$0xff] %vm1568_vm1, %v1544_v42  ;;  %v1163_v44 = vmin.f32 %v2331_v40, 20.0  ;;  %1072 = vadd.xlane.f32.xlu1 %v1015_v41  ;;  %vm1131_vm10 = vcmp.gt.f32.partialorder %v2331_v40, 20.0 }
 0x285   : > { %v939_v46 = vpop.f32.mrf.mxu3 }
 0x286   : > { %v1843_v39 = vpop.eup %1842  ;;  %v1206_v47 = vmul.f32 1.442695, %v1163_v44  ;;  %v940_v38 = vadd.f32 %v2177_v54, %v939_v46 }
 0x287   : > { %v1845_v48 = vpop.eup %1844  ;;  %v1338_v50 = vadd.f32 1.0, %v1843_v39  ;;  %v1341_v51 = vmul.f32 -0.5, %v1843_v39  ;;  %v1344_v0 = vand.u32 2147483647, %v1843_v39 }
 0x288   : > { %v1331_v52 = vmul.f32 0.6931472, %v1845_v48  ;;  %1846 = vpow2.f32 %v1206_v47  ;;  %v980_v49 = vmax.f32 %v940_v38, 0.0 }
 0x289   : > { %1848 = vlog2.f32 %v1338_v50  ;;  %v1047_v55 = vpop.xlane.xlu0 %1046  ;;  %v1342_v62 = vadd.f32 1.0, %v1341_v51  ;;  %vm1345_vm7 = vcmp.lt.f32.partialorder %v1344_v0, 0.0004427343 }
 0x28a   : > { %v1337_v56 = vsel %vm1336_vm5, %v1334_v53, %v1331_v52  ;;  %v2341_v59 = vadd.f32 %v2228_v43, %v1047_v55  ;;  %v1016_v60 = vmul.f32 %v2183_v58, %v980_v49 }
 0x28b   : > { %v1545_v61 = vsel %vm1129_vm6, %v2312_v3, %v1337_v56  ;;  %v1343_v8 = vmul.f32 %v1843_v39, %v1342_v62 }
 0x28c   : > { %1578 = vst.msk [vmem:[%s2251_s26 + $0x48] sm:$0xff] %vm1568_vm1, %v1545_v61  ;;  %v1164_v63 = vmin.f32 %v2341_v59, 20.0  ;;  %1074 = vadd.xlane.f32.xlu2 %v1016_v60  ;;  %vm1132_vm12 = vcmp.gt.f32.partialorder %v2341_v59, 20.0 }
 0x28d   : > { %v941_v57 = vpop.f32.mrf.mxu3 }
 0x28e   : > { %v1847_v1 = vpop.eup %1846  ;;  %v1208_v5 = vmul.f32 1.442695, %v1164_v63  ;;  %v942_v6 = vadd.f32 %v2177_v54, %v941_v57 }
 0x28f   : > { %v1849_v7 = vpop.eup %1848  ;;  %v1347_v9 = vadd.f32 1.0, %v1847_v1  ;;  %v1350_v10 = vmul.f32 -0.5, %v1847_v1  ;;  %v1353_v13 = vand.u32 2147483647, %v1847_v1 }
 0x290   : > { %v1340_v2 = vmul.f32 0.6931472, %v1849_v7  ;;  %1850 = vpow2.f32 %v1208_v5  ;;  %v981_v3 = vmax.f32 %v942_v6, 0.0 }
 0x291   : > { %1852 = vlog2.f32 %v1347_v9  ;;  %v1049_v11 = vpop.xlane.xlu1 %1048  ;;  %v1351_v17 = vadd.f32 1.0, %v1350_v10  ;;  %vm1354_vm9 = vcmp.lt.f32.partialorder %v1353_v13, 0.0004427343 }
 0x292   : > { %v1346_v12 = vsel %vm1345_vm7, %v1343_v8, %v1340_v2  ;;  %v2351_v14 = vadd.f32 %v2228_v43, %v1049_v11  ;;  %v1017_v15 = vmul.f32 %v2183_v58, %v981_v3 }
 0x293   : > { %v1546_v16 = vsel %vm1130_vm8, %v2321_v21, %v1346_v12  ;;  %v1352_v28 = vmul.f32 %v1847_v1, %v1351_v17 }
 0x294   : > { %1579 = vst.msk [vmem:[%s2251_s26 + $0x50] sm:$0xff] %vm1568_vm1, %v1546_v16  ;;  %v1165_v18 = vmin.f32 %v2351_v14, 20.0  ;;  %1076 = vadd.xlane.f32.xlu0 %v1017_v15  ;;  %vm1133_vm14 = vcmp.gt.f32.partialorder %v2351_v14, 20.0 }
 0x295   : > { %v944_v19 = vpop.f32.mrf.mxu3 }
 0x296   : > { %v1851_v22 = vpop.eup %1850  ;;  %v1210_v23 = vmul.f32 1.442695, %v1165_v18  ;;  %v945_v24 = vadd.f32 %v2177_v54, %v944_v19 }
 0x297   : > { %v1853_v25 = vpop.eup %1852  ;;  %v1356_v26 = vadd.f32 1.0, %v1851_v22  ;;  %v1359_v27 = vmul.f32 -0.5, %v1851_v22  ;;  %v1362_v36 = vand.u32 2147483647, %v1851_v22 }
 0x298   : > { %v1349_v20 = vmul.f32 0.6931472, %v1853_v25  ;;  %1854 = vpow2.f32 %v1210_v23  ;;  %v982_v21 = vmax.f32 %v945_v24, 0.0 }
 0x299   : > { %1856 = vlog2.f32 %v1356_v26  ;;  %v1051_v29 = vpop.xlane.xlu2 %1050  ;;  %v1360_v35 = vadd.f32 1.0, %v1359_v27  ;;  %vm1363_vm11 = vcmp.lt.f32.partialorder %v1362_v36, 0.0004427343 }
 0x29a   : > { %v1355_v30 = vsel %vm1354_vm9, %v1352_v28, %v1349_v20  ;;  %v2361_v32 = vadd.f32 %v2228_v43, %v1051_v29  ;;  %v1018_v33 = vmul.f32 %v2183_v58, %v982_v21 }
 0x29b   : > { %v1547_v34 = vsel %vm1131_vm10, %v2331_v40, %v1355_v30  ;;  %v1361_v45 = vmul.f32 %v1851_v22, %v1360_v35 }
 0x29c   : > { %1580 = vst.msk [vmem:[%s2251_s26 + $0x58] sm:$0xff] %vm1568_vm1, %v1547_v34  ;;  %v1166_v31 = vmin.f32 %v2361_v32, 20.0  ;;  %1078 = vadd.xlane.f32.xlu1 %v1018_v33  ;;  %vm1134_vm0 = vcmp.gt.f32.partialorder %v2361_v32, 20.0 }
 0x29d   : > { %v946_v37 = vpop.f32.mrf.mxu3 }
 0x29e   : > { %v1855_v41 = vpop.eup %1854  ;;  %v1212_v42 = vmul.f32 1.442695, %v1166_v31  ;;  %v947_v4 = vadd.f32 %v2177_v54, %v946_v37 }
 0x29f   : > { %v1857_v44 = vpop.eup %1856  ;;  %v1365_v46 = vadd.f32 1.0, %v1855_v41  ;;  %v1368_v47 = vmul.f32 -0.5, %v1855_v41  ;;  %v1371_v55 = vand.u32 2147483647, %v1855_v41 }
 0x2a0   : > { %v1358_v39 = vmul.f32 0.6931472, %v1857_v44  ;;  %1858 = vpow2.f32 %v1212_v42  ;;  %v983_v40 = vmax.f32 %v947_v4, 0.0 }
 0x2a1   : > { %1860 = vlog2.f32 %v1365_v46  ;;  %v1053_v38 = vpop.xlane.xlu0 %1052  ;;  %v1369_v53 = vadd.f32 1.0, %v1368_v47  ;;  %vm1372_vm13 = vcmp.lt.f32.partialorder %v1371_v55, 0.0004427343 }
 0x2a2   : > { %v1364_v48 = vsel %vm1363_vm11, %v1361_v45, %v1358_v39  ;;  %v2371_v50 = vadd.f32 %v2228_v43, %v1053_v38  ;;  %v1019_v51 = vmul.f32 %v2183_v58, %v983_v40 }
 0x2a3   : > { %v1548_v52 = vsel %vm1132_vm12, %v2341_v59, %v1364_v48  ;;  %v1370_v5 = vmul.f32 %v1855_v41, %v1369_v53 }
 0x2a4   : > { %1581 = vst.msk [vmem:[%s2251_s26 + $0x60] sm:$0xff] %vm1568_vm1, %v1548_v52  ;;  %v1167_v49 = vmin.f32 %v2371_v50, 20.0  ;;  %1080 = vadd.xlane.f32.xlu2 %v1019_v51  ;;  %vm1135_vm3 = vcmp.gt.f32.partialorder %v2371_v50, 20.0 }
 0x2a5   : > { %v949_v56 = vpop.f32.mrf.mxu3 }
 0x2a6   : > { %v1859_v60 = vpop.eup %1858  ;;  %v1214_v61 = vmul.f32 1.442695, %v1167_v49  ;;  %v950_v62 = vadd.f32 %v2177_v54, %v949_v56 }
 0x2a7   : > { %v1861_v63 = vpop.eup %1860  ;;  %v1374_v0 = vadd.f32 1.0, %v1859_v60  ;;  %v1377_v57 = vmul.f32 -0.5, %v1859_v60  ;;  %v1380_v11 = vand.u32 2147483647, %v1859_v60 }
 0x2a8   : > { %v1367_v1 = vmul.f32 0.6931472, %v1861_v63  ;;  %1862 = vpow2.f32 %v1214_v61  ;;  %v984_v59 = vmax.f32 %v950_v62, 0.0 }
 0x2a9   : > { %1864 = vlog2.f32 %v1374_v0  ;;  %v1055_v6 = vpop.xlane.xlu1 %1054  ;;  %v1378_v10 = vadd.f32 1.0, %v1377_v57  ;;  %vm1381_vm15 = vcmp.lt.f32.partialorder %v1380_v11, 0.0004427343 }
 0x2aa   : > { %v1373_v7 = vsel %vm1372_vm13, %v1370_v5, %v1367_v1  ;;  %v2381_v8 = vadd.f32 %v2228_v43, %v1055_v6  ;;  %v1020_v9 = vmul.f32 %v2183_v58, %v984_v59 }
 0x2ab   : > { %v1549_v2 = vsel %vm1133_vm14, %v2351_v14, %v1373_v7  ;;  %v1379_v13 = vmul.f32 %v1859_v60, %v1378_v10 }
 0x2ac   : > { %1582 = vst.msk [vmem:[%s2251_s26 + $0x68] sm:$0xff] %vm1568_vm1, %v1549_v2  ;;  %v1168_v3 = vmin.f32 %v2381_v8, 20.0  ;;  %1082 = vadd.xlane.f32.xlu0 %v1020_v9  ;;  %vm1136_vm5 = vcmp.gt.f32.partialorder %v2381_v8, 20.0 }
 0x2ad   : > { %v951_v12 = vpop.f32.mrf.mxu3 }
 0x2ae   : > { %v1863_v15 = vpop.eup %1862  ;;  %v1216_v16 = vmul.f32 1.442695, %v1168_v3  ;;  %v952_v17 = vadd.f32 %v2177_v54, %v951_v12  ;;  %v1932_v54 = vld [vmem:[%s2459_s7] ss:$0 sm:$0xff] }
 0x2af   : > { %v1865_v18 = vpop.eup %1864  ;;  %v1383_v19 = vadd.f32 1.0, %v1863_v15  ;;  %v1386_v58 = vmul.f32 -0.5, %v1863_v15  ;;  %v1389_v21 = vand.u32 2147483647, %v1863_v15 }
 0x2b0   : > { %v1376_v22 = vmul.f32 0.6931472, %v1865_v18  ;;  %1866 = vpow2.f32 %v1216_v16  ;;  %v985_v14 = vmax.f32 %v952_v17, 0.0 }
 0x2b1   : > { %1868 = vlog2.f32 %v1383_v19  ;;  %v1057_v23 = vpop.xlane.xlu2 %1056  ;;  %v1387_v20 = vadd.f32 1.0, %v1386_v58  ;;  %vm1390_vm2 = vcmp.lt.f32.partialorder %v1389_v21, 0.0004427343 }
 0x2b2   : > { %v1382_v24 = vsel %vm1381_vm15, %v1379_v13, %v1376_v22  ;;  %v1105_v25 = vadd.f32 %v2228_v43, %v1057_v23  ;;  %v1021_v26 = vmul.f32 %v1932_v54, %v985_v14 }
 0x2b3   : > { %v1550_v27 = vsel %vm1134_vm0, %v2361_v32, %v1382_v24  ;;  %v1388_v31 = vmul.f32 %v1863_v15, %v1387_v20 }
 0x2b4   : > { %1583 = vst.msk [vmem:[%s2251_s26 + $0x70] sm:$0xff] %vm1568_vm1, %v1550_v27  ;;  %v1169_v28 = vmin.f32 %v1105_v25, 20.0  ;;  %1084 = vadd.xlane.f32.xlu1 %v1021_v26  ;;  %vm1137_vm7 = vcmp.gt.f32.partialorder %v1105_v25, 20.0 }
 0x2b6   : > { %v1867_v29 = vpop.eup %1866  ;;  %v1218_v30 = vmul.f32 1.442695, %v1169_v28 }
 0x2b7   : > { %v1869_v33 = vpop.eup %1868  ;;  %v1392_v34 = vadd.f32 1.0, %v1867_v29  ;;  %v1395_v36 = vmul.f32 -0.5, %v1867_v29  ;;  %v1398_v45 = vand.u32 2147483647, %v1867_v29 }
 0x2b8   : > { %v1385_v35 = vmul.f32 0.6931472, %v1869_v33  ;;  %1870 = vpow2.f32 %v1218_v30 }
 0x2b9   : > { %1872 = vlog2.f32 %v1392_v34  ;;  %v1059_v37 = vpop.xlane.xlu0 %1058  ;;  %v1396_v4 = vadd.f32 1.0, %v1395_v36  ;;  %vm1399_vm4 = vcmp.lt.f32.partialorder %v1398_v45, 0.0004427343 }
 0x2ba   : > { %v1391_v32 = vsel %vm1390_vm2, %v1388_v31, %v1385_v35  ;;  %v1106_v41 = vadd.f32 %v2228_v43, %v1059_v37 }
 0x2bb   : > { %v1551_v42 = vsel %vm1135_vm3, %v2371_v50, %v1391_v32  ;;  %v1397_v48 = vmul.f32 %v1867_v29, %v1396_v4 }
 0x2bc   : > { %1584 = vst.msk [vmem:[%s2251_s26 + $0x78] sm:$0xff] %vm1568_vm1, %v1551_v42  ;;  %v1170_v44 = vmin.f32 %v1106_v41, 20.0  ;;  %vm1138_vm9 = vcmp.gt.f32.partialorder %v1106_v41, 20.0 }
 0x2be   : > { %v1871_v46 = vpop.eup %1870  ;;  %v1220_v39 = vmul.f32 1.442695, %v1170_v44 }
 0x2bf   : > { %v1873_v47 = vpop.eup %1872  ;;  %v1401_v40 = vadd.f32 1.0, %v1871_v46  ;;  %v1404_v51 = vmul.f32 -0.5, %v1871_v46  ;;  %v1407_v60 = vand.u32 2147483647, %v1871_v46 }
 0x2c0   : > { %v1394_v38 = vmul.f32 0.6931472, %v1873_v47  ;;  %1874 = vpow2.f32 %v1220_v39 }
 0x2c1   : > { %1876 = vlog2.f32 %v1401_v40  ;;  %v1061_v52 = vpop.xlane.xlu1 %1060  ;;  %v1405_v55 = vadd.f32 1.0, %v1404_v51  ;;  %vm1408_vm6 = vcmp.lt.f32.partialorder %v1407_v60, 0.0004427343 }
 0x2c2   : > { %v1400_v50 = vsel %vm1399_vm4, %v1397_v48, %v1394_v38  ;;  %v1107_v53 = vadd.f32 %v2228_v43, %v1061_v52 }
 0x2c3   : > { %v1552_v49 = vsel %vm1136_vm5, %v2381_v8, %v1400_v50  ;;  %v1406_v1 = vmul.f32 %v1871_v46, %v1405_v55 }
 0x2c4   : > { %1585 = vst.msk [vmem:[%s2251_s26 + $0x80] sm:$0xff] %vm1568_vm1, %v1552_v49  ;;  %v1171_v56 = vmin.f32 %v1107_v53, 20.0  ;;  %vm1139_vm11 = vcmp.gt.f32.partialorder %v1107_v53, 20.0 }
 0x2c6   : > { %v1875_v61 = vpop.eup %1874  ;;  %v1222_v62 = vmul.f32 1.442695, %v1171_v56 }
 0x2c7   : > { %v1877_v63 = vpop.eup %1876  ;;  %v1410_v0 = vadd.f32 1.0, %v1875_v61  ;;  %v1413_v5 = vmul.f32 -0.5, %v1875_v61  ;;  %v1416_v10 = vand.u32 2147483647, %v1875_v61 }
 0x2c8   : > { %v1403_v57 = vmul.f32 0.6931472, %v1877_v63  ;;  %1878 = vpow2.f32 %v1222_v62 }
 0x2c9   : > { %1880 = vlog2.f32 %v1410_v0  ;;  %v1063_v59 = vpop.xlane.xlu2 %1062  ;;  %v1414_v9 = vadd.f32 1.0, %v1413_v5  ;;  %vm1417_vm8 = vcmp.lt.f32.partialorder %v1416_v10, 0.0004427343 }
 0x2ca   : > { %v1409_v6 = vsel %vm1408_vm6, %v1406_v1, %v1403_v57  ;;  %v1108_v7 = vadd.f32 %v2228_v43, %v1063_v59 }
 0x2cb   : > { %v1553_v8 = vsel %vm1137_vm7, %v1105_v25, %v1409_v6  ;;  %v1415_v17 = vmul.f32 %v1875_v61, %v1414_v9 }
 0x2cc   : > { %1586 = vst.msk [vmem:[%s2251_s26 + $0x88] sm:$0xff] %vm1568_vm1, %v1553_v8  ;;  %v1172_v2 = vmin.f32 %v1108_v7, 20.0  ;;  %vm1140_vm13 = vcmp.gt.f32.partialorder %v1108_v7, 20.0 }
 0x2ce   : > { %v1879_v3 = vpop.eup %1878  ;;  %v1224_v11 = vmul.f32 1.442695, %v1172_v2 }
 0x2cf   : > { %v1881_v12 = vpop.eup %1880  ;;  %v1419_v15 = vadd.f32 1.0, %v1879_v3  ;;  %v1422_v18 = vmul.f32 -0.5, %v1879_v3  ;;  %v1425_v24 = vand.u32 2147483647, %v1879_v3 }
 0x2d0   : > { %v1412_v16 = vmul.f32 0.6931472, %v1881_v12  ;;  %1882 = vpow2.f32 %v1224_v11 }
 0x2d1   : > { %1884 = vlog2.f32 %v1419_v15  ;;  %v1065_v13 = vpop.xlane.xlu0 %1064  ;;  %v1423_v14 = vadd.f32 1.0, %v1422_v18  ;;  %vm1426_vm10 = vcmp.lt.f32.partialorder %v1425_v24, 0.0004427343 }
 0x2d2   : > { %v1418_v19 = vsel %vm1417_vm8, %v1415_v17, %v1412_v16  ;;  %v1109_v22 = vadd.f32 %v2228_v43, %v1065_v13 }
 0x2d3   : > { %v1554_v58 = vsel %vm1138_vm9, %v1106_v41, %v1418_v19  ;;  %v1424_v28 = vmul.f32 %v1879_v3, %v1423_v14 }
 0x2d4   : > { %1587 = vst.msk [vmem:[%s2251_s26 + $0x90] sm:$0xff] %vm1568_vm1, %v1554_v58  ;;  %v1173_v23 = vmin.f32 %v1109_v22, 20.0  ;;  %vm1141_vm15 = vcmp.gt.f32.partialorder %v1109_v22, 20.0 }
 0x2d6   : > { %v1883_v25 = vpop.eup %1882  ;;  %v1226_v54 = vmul.f32 1.442695, %v1173_v23 }
 0x2d7   : > { %v1885_v26 = vpop.eup %1884  ;;  %v1428_v27 = vadd.f32 1.0, %v1883_v25  ;;  %v1431_v21 = vmul.f32 -0.5, %v1883_v25  ;;  %v1434_v36 = vand.u32 2147483647, %v1883_v25 }
 0x2d8   : > { %v1421_v20 = vmul.f32 0.6931472, %v1885_v26  ;;  %1886 = vpow2.f32 %v1226_v54 }
 0x2d9   : > { %1888 = vlog2.f32 %v1428_v27  ;;  %v1067_v29 = vpop.xlane.xlu1 %1066  ;;  %v1432_v35 = vadd.f32 1.0, %v1431_v21  ;;  %vm1435_vm12 = vcmp.lt.f32.partialorder %v1434_v36, 0.0004427343 }
 0x2da   : > { %v1427_v30 = vsel %vm1426_vm10, %v1424_v28, %v1421_v20  ;;  %v1110_v33 = vadd.f32 %v2228_v43, %v1067_v29 }
 0x2db   : > { %v1555_v34 = vsel %vm1139_vm11, %v1107_v53, %v1427_v30  ;;  %v1433_v44 = vmul.f32 %v1883_v25, %v1432_v35 }
 0x2dc   : > { %1588 = vst.msk [vmem:[%s2251_s26 + $0x98] sm:$0xff] %vm1568_vm1, %v1555_v34  ;;  %v1174_v31 = vmin.f32 %v1110_v33, 20.0  ;;  %vm1142_vm2 = vcmp.gt.f32.partialorder %v1110_v33, 20.0 }
 0x2de   : > { %v1887_v37 = vpop.eup %1886  ;;  %v1228_v32 = vmul.f32 1.442695, %v1174_v31 }
 0x2df   : > { %v1889_v41 = vpop.eup %1888  ;;  %v1437_v42 = vadd.f32 1.0, %v1887_v37  ;;  %v1440_v45 = vmul.f32 -0.5, %v1887_v37  ;;  %v1443_v51 = vand.u32 2147483647, %v1887_v37 }
 0x2e0   : > { %v1430_v4 = vmul.f32 0.6931472, %v1889_v41  ;;  %1890 = vpow2.f32 %v1228_v32 }
 0x2e1   : > { %1892 = vlog2.f32 %v1437_v42  ;;  %v1069_v46 = vpop.xlane.xlu2 %1068  ;;  %v1441_v38 = vadd.f32 1.0, %v1440_v45  ;;  %vm1444_vm14 = vcmp.lt.f32.partialorder %v1443_v51, 0.0004427343 }
 0x2e2   : > { %v1436_v39 = vsel %vm1435_vm12, %v1433_v44, %v1430_v4  ;;  %v1111_v47 = vadd.f32 %v2228_v43, %v1069_v46 }
 0x2e3   : > { %v1556_v40 = vsel %vm1140_vm13, %v1108_v7, %v1436_v39  ;;  %v1442_v56 = vmul.f32 %v1887_v37, %v1441_v38 }
 0x2e4   : > { %1589 = vst.msk [vmem:[%s2251_s26 + $0xa0] sm:$0xff] %vm1568_vm1, %v1556_v40  ;;  %v1175_v48 = vmin.f32 %v1111_v47, 20.0  ;;  %vm1143_vm4 = vcmp.gt.f32.partialorder %v1111_v47, 20.0 }
 0x2e6   : > { %v1891_v52 = vpop.eup %1890  ;;  %v1230_v50 = vmul.f32 1.442695, %v1175_v48 }
 0x2e7   : > { %v1893_v53 = vpop.eup %1892  ;;  %v1446_v49 = vadd.f32 1.0, %v1891_v52  ;;  %v1449_v60 = vmul.f32 -0.5, %v1891_v52  ;;  %v1452_v0 = vand.u32 2147483647, %v1891_v52 }
 0x2e8   : > { %v1439_v55 = vmul.f32 0.6931472, %v1893_v53  ;;  %1894 = vpow2.f32 %v1230_v50 }
 0x2e9   : > { %1896 = vlog2.f32 %v1446_v49  ;;  %v1450_v63 = vadd.f32 1.0, %v1449_v60  ;;  %vm1453_vm0 = vcmp.lt.f32.partialorder %v1452_v0, 0.0004427343 }
 0x2ea   : > { %v1445_v61 = vsel %vm1444_vm14, %v1442_v56, %v1439_v55 }
 0x2eb   : > { %v1557_v62 = vsel %vm1141_vm15, %v1109_v22, %v1445_v61  ;;  %v1451_v7 = vmul.f32 %v1891_v52, %v1450_v63 }
 0x2ec   : > { %1590 = vst.msk [vmem:[%s2251_s26 + $0xa8] sm:$0xff] %vm1568_vm1, %v1557_v62 }
 0x2ee   : > { %v1895_v57 = vpop.eup %1894 }
 0x2ef   : > { %v1897_v1 = vpop.eup %1896  ;;  %v1455_v5 = vadd.f32 1.0, %v1895_v57  ;;  %v1071_v59 = vpop.xlane.xlu0 %1070  ;;  %v1458_v8 = vmul.f32 -0.5, %v1895_v57  ;;  %v1461_v15 = vand.u32 2147483647, %v1895_v57 }
 0x2f0   : > { %v1448_v6 = vmul.f32 0.6931472, %v1897_v1  ;;  %v1112_v9 = vadd.f32 %v2228_v43, %v1071_v59 }
 0x2f1   : > { %1898 = vlog2.f32 %v1455_v5  ;;  %v1459_v11 = vadd.f32 1.0, %v1458_v8  ;;  %vm1462_vm3 = vcmp.lt.f32.partialorder %v1461_v15, 0.0004427343 }
 0x2f2   : > { %v1454_v2 = vsel %vm1453_vm0, %v1451_v7, %v1448_v6  ;;  %v1176_v10 = vmin.f32 %v1112_v9, 20.0  ;;  %vm1144_vm6 = vcmp.gt.f32.partialorder %v1112_v9, 20.0 }
 0x2f3   : > { %v1558_v3 = vsel %vm1142_vm2, %v1110_v33, %v1454_v2  ;;  %v1460_v13 = vmul.f32 %v1895_v57, %v1459_v11 }
 0x2f4   : > { %1591 = vst.msk [vmem:[%s2251_s26 + $0xb0] sm:$0xff] %vm1568_vm1, %v1558_v3  ;;  %v1232_v12 = vmul.f32 1.442695, %v1176_v10 }
 0x2f6   : > { %1900 = vpow2.f32 %v1232_v12 }
 0x2f7   : > { %v1899_v16 = vpop.eup %1898  ;;  %v1073_v17 = vpop.xlane.xlu1 %1072 }
 0x2f8   : > { %v1457_v18 = vmul.f32 0.6931472, %v1899_v16  ;;  %v1113_v19 = vadd.f32 %v2228_v43, %v1073_v17 }
 0x2fa   : > { %v1463_v22 = vsel %vm1462_vm3, %v1460_v13, %v1457_v18  ;;  %v1177_v58 = vmin.f32 %v1113_v19, 20.0  ;;  %vm1145_vm8 = vcmp.gt.f32.partialorder %v1113_v19, 20.0 }
 0x2fb   : > { %v1559_v14 = vsel %vm1143_vm4, %v1111_v47, %v1463_v22 }
 0x2fc   : > { %v1901_v23 = vpop.eup %1900  ;;  %1592 = vst.msk [vmem:[%s2251_s26 + $0xb8] sm:$0xff] %vm1568_vm1, %v1559_v14  ;;  %v1234_v24 = vmul.f32 1.442695, %v1177_v58 }
 0x2fd   : > { %v1464_v25 = vadd.f32 1.0, %v1901_v23  ;;  %v1467_v54 = vmul.f32 -0.5, %v1901_v23  ;;  %v1470_v21 = vand.u32 2147483647, %v1901_v23 }
 0x2fe   : > { %1902 = vpow2.f32 %v1234_v24 }
 0x2ff   : > { %1904 = vlog2.f32 %v1464_v25  ;;  %v1075_v26 = vpop.xlane.xlu2 %1074  ;;  %v1468_v20 = vadd.f32 1.0, %v1467_v54  ;;  %vm1471_vm5 = vcmp.lt.f32.partialorder %v1470_v21, 0.0004427343 }
 0x300   : > { %v1114_v27 = vadd.f32 %v2228_v43, %v1075_v26 }
 0x301   : > { %v1469_v31 = vmul.f32 %v1901_v23, %v1468_v20 }
 0x302   : > { %v1178_v28 = vmin.f32 %v1114_v27, 20.0  ;;  %vm1146_vm10 = vcmp.gt.f32.partialorder %v1114_v27, 20.0 }
 0x304   : > { %v1903_v29 = vpop.eup %1902  ;;  %v1236_v30 = vmul.f32 1.442695, %v1178_v28 }
 0x305   : > { %v1905_v33 = vpop.eup %1904  ;;  %v1473_v34 = vadd.f32 1.0, %v1903_v29  ;;  %v1476_v36 = vmul.f32 -0.5, %v1903_v29  ;;  %v1479_v45 = vand.u32 2147483647, %v1903_v29 }
 0x306   : > { %v1466_v35 = vmul.f32 0.6931472, %v1905_v33  ;;  %1906 = vpow2.f32 %v1236_v30 }
 0x307   : > { %1908 = vlog2.f32 %v1473_v34  ;;  %v1077_v37 = vpop.xlane.xlu0 %1076  ;;  %v1477_v4 = vadd.f32 1.0, %v1476_v36  ;;  %vm1480_vm7 = vcmp.lt.f32.partialorder %v1479_v45, 0.0004427343 }
 0x308   : > { %v1472_v32 = vsel %vm1471_vm5, %v1469_v31, %v1466_v35  ;;  %v1115_v41 = vadd.f32 %v2228_v43, %v1077_v37 }
 0x309   : > { %v1560_v42 = vsel %vm1144_vm6, %v1112_v9, %v1472_v32  ;;  %v1478_v48 = vmul.f32 %v1903_v29, %v1477_v4 }
 0x30a   : > { %1593 = vst.msk [vmem:[%s2251_s26 + $0xc0] sm:$0xff] %vm1568_vm1, %v1560_v42  ;;  %v1179_v44 = vmin.f32 %v1115_v41, 20.0  ;;  %vm1147_vm12 = vcmp.gt.f32.partialorder %v1115_v41, 20.0 }
 0x30c   : > { %v1907_v46 = vpop.eup %1906  ;;  %v1238_v39 = vmul.f32 1.442695, %v1179_v44 }
 0x30d   : > { %v1909_v47 = vpop.eup %1908  ;;  %v1482_v40 = vadd.f32 1.0, %v1907_v46  ;;  %v1485_v51 = vmul.f32 -0.5, %v1907_v46  ;;  %v1488_v60 = vand.u32 2147483647, %v1907_v46 }
 0x30e   : > { %v1475_v38 = vmul.f32 0.6931472, %v1909_v47  ;;  %1910 = vpow2.f32 %v1238_v39 }
 0x30f   : > { %1912 = vlog2.f32 %v1482_v40  ;;  %v1079_v52 = vpop.xlane.xlu1 %1078  ;;  %v1486_v55 = vadd.f32 1.0, %v1485_v51  ;;  %vm1489_vm9 = vcmp.lt.f32.partialorder %v1488_v60, 0.0004427343 }
 0x310   : > { %v1481_v50 = vsel %vm1480_vm7, %v1478_v48, %v1475_v38  ;;  %v1116_v53 = vadd.f32 %v2228_v43, %v1079_v52 }
 0x311   : > { %v1561_v49 = vsel %vm1145_vm8, %v1113_v19, %v1481_v50  ;;  %v1487_v1 = vmul.f32 %v1907_v46, %v1486_v55 }
 0x312   : > { %1594 = vst.msk [vmem:[%s2251_s26 + $0xc8] sm:$0xff] %vm1568_vm1, %v1561_v49  ;;  %v1180_v56 = vmin.f32 %v1116_v53, 20.0  ;;  %vm1148_vm14 = vcmp.gt.f32.partialorder %v1116_v53, 20.0 }
 0x314   : > { %v1911_v61 = vpop.eup %1910  ;;  %v1240_v62 = vmul.f32 1.442695, %v1180_v56 }
 0x315   : > { %v1913_v63 = vpop.eup %1912  ;;  %v1491_v0 = vadd.f32 1.0, %v1911_v61  ;;  %v1494_v5 = vmul.f32 -0.5, %v1911_v61  ;;  %v1497_v10 = vand.u32 2147483647, %v1911_v61 }
 0x316   : > { %v1484_v57 = vmul.f32 0.6931472, %v1913_v63  ;;  %1914 = vpow2.f32 %v1240_v62 }
 0x317   : > { %1916 = vlog2.f32 %v1491_v0  ;;  %v1081_v59 = vpop.xlane.xlu2 %1080  ;;  %v1495_v9 = vadd.f32 1.0, %v1494_v5  ;;  %vm1498_vm11 = vcmp.lt.f32.partialorder %v1497_v10, 0.0004427343 }
 0x318   : > { %v1490_v6 = vsel %vm1489_vm9, %v1487_v1, %v1484_v57  ;;  %v1117_v7 = vadd.f32 %v2228_v43, %v1081_v59 }
 0x319   : > { %v1562_v8 = vsel %vm1146_vm10, %v1114_v27, %v1490_v6  ;;  %v1496_v17 = vmul.f32 %v1911_v61, %v1495_v9 }
 0x31a   : > { %1595 = vst.msk [vmem:[%s2251_s26 + $0xd0] sm:$0xff] %vm1568_vm1, %v1562_v8  ;;  %v1181_v2 = vmin.f32 %v1117_v7, 20.0  ;;  %vm1149_vm0 = vcmp.gt.f32.partialorder %v1117_v7, 20.0 }
 0x31c   : > { %v1915_v3 = vpop.eup %1914  ;;  %v1242_v11 = vmul.f32 1.442695, %v1181_v2 }
 0x31d   : > { %v1917_v12 = vpop.eup %1916  ;;  %v1500_v15 = vadd.f32 1.0, %v1915_v3  ;;  %v1503_v18 = vmul.f32 -0.5, %v1915_v3  ;;  %v1506_v24 = vand.u32 2147483647, %v1915_v3 }
 0x31e   : > { %v1493_v16 = vmul.f32 0.6931472, %v1917_v12  ;;  %1918 = vpow2.f32 %v1242_v11 }
 0x31f   : > { %1920 = vlog2.f32 %v1500_v15  ;;  %v1083_v13 = vpop.xlane.xlu0 %1082  ;;  %v1504_v14 = vadd.f32 1.0, %v1503_v18  ;;  %vm1507_vm13 = vcmp.lt.f32.partialorder %v1506_v24, 0.0004427343 }
 0x320   : > { %v1499_v19 = vsel %vm1498_vm11, %v1496_v17, %v1493_v16  ;;  %v1118_v22 = vadd.f32 %v2228_v43, %v1083_v13 }
 0x321   : > { %v1563_v58 = vsel %vm1147_vm12, %v1115_v41, %v1499_v19  ;;  %v1505_v28 = vmul.f32 %v1915_v3, %v1504_v14 }
 0x322   : > { %1596 = vst.msk [vmem:[%s2251_s26 + $0xd8] sm:$0xff] %vm1568_vm1, %v1563_v58  ;;  %v1182_v23 = vmin.f32 %v1118_v22, 20.0  ;;  %vm1150_vm3 = vcmp.gt.f32.partialorder %v1118_v22, 20.0 }
 0x324   : > { %v1919_v25 = vpop.eup %1918  ;;  %v1244_v54 = vmul.f32 1.442695, %v1182_v23 }
 0x325   : > { %v1921_v26 = vpop.eup %1920  ;;  %v1509_v27 = vadd.f32 1.0, %v1919_v25  ;;  %v1512_v21 = vmul.f32 -0.5, %v1919_v25  ;;  %v1515_v36 = vand.u32 2147483647, %v1919_v25 }
 0x326   : > { %v1502_v20 = vmul.f32 0.6931472, %v1921_v26  ;;  %1922 = vpow2.f32 %v1244_v54 }
 0x327   : > { %1924 = vlog2.f32 %v1509_v27  ;;  %v1085_v29 = vpop.xlane.xlu1 %1084  ;;  %v1513_v35 = vadd.f32 1.0, %v1512_v21  ;;  %vm1516_vm15 = vcmp.lt.f32.partialorder %v1515_v36, 0.0004427343 }
 0x328   : > { %v1508_v30 = vsel %vm1507_vm13, %v1505_v28, %v1502_v20  ;;  %v1119_v33 = vadd.f32 %v2228_v43, %v1085_v29 }
 0x329   : > { %v1564_v34 = vsel %vm1148_vm14, %v1116_v53, %v1508_v30  ;;  %v1514_v44 = vmul.f32 %v1919_v25, %v1513_v35 }
 0x32a   : > { %1597 = vst.msk [vmem:[%s2251_s26 + $0xe0] sm:$0xff] %vm1568_vm1, %v1564_v34  ;;  %v1183_v31 = vmin.f32 %v1119_v33, 20.0  ;;  %vm1151_vm5 = vcmp.gt.f32.partialorder %v1119_v33, 20.0 }
 0x32c   : > { %v1923_v37 = vpop.eup %1922  ;;  %v1246_v32 = vmul.f32 1.442695, %v1183_v31 }
 0x32d   : > { %v1925_v41 = vpop.eup %1924  ;;  %v1518_v42 = vadd.f32 1.0, %v1923_v37  ;;  %v1521_v45 = vmul.f32 -0.5, %v1923_v37  ;;  %v1524_v47 = vand.u32 2147483647, %v1923_v37 }
 0x32e   : > { %v1511_v4 = vmul.f32 0.6931472, %v1925_v41  ;;  %1926 = vpow2.f32 %v1246_v32 }
 0x32f   : > { %1928 = vlog2.f32 %v1518_v42  ;;  %v1522_v39 = vadd.f32 1.0, %v1521_v45  ;;  %vm1525_vm2 = vcmp.lt.f32.partialorder %v1524_v47, 0.0004427343 }
 0x330   : > { %v1517_v46 = vsel %vm1516_vm15, %v1514_v44, %v1511_v4 }
 0x331   : > { %v1565_v43 = vsel %vm1149_vm0, %v1117_v7, %v1517_v46  ;;  %v1523_v52 = vmul.f32 %v1923_v37, %v1522_v39 }
 0x332   : > { %1598 = vst.msk [vmem:[%s2251_s26 + $0xe8] sm:$0xff] %vm1568_vm1, %v1565_v43 }
 0x334   : > { %v1927_v40 = vpop.eup %1926 }
 0x335   : > { %v1929_v38 = vpop.eup %1928  ;;  %v1527_v48 = vadd.f32 1.0, %v1927_v40  ;;  %v1530_v50 = vmul.f32 -0.5, %v1927_v40  ;;  %v1533_v56 = vand.u32 2147483647, %v1927_v40 }
 0x336   : > { %v1520_v51 = vmul.f32 0.6931472, %v1929_v38 }
 0x337   : > { %1930 = vlog2.f32 %v1527_v48  ;;  %v1531_v55 = vadd.f32 1.0, %v1530_v50  ;;  %vm1534_vm4 = vcmp.lt.f32.partialorder %v1533_v56, 0.0004427343 }
 0x338   : > { %v1526_v53 = vsel %vm1525_vm2, %v1523_v52, %v1520_v51 }
 0x339   : > { %v1566_v49 = vsel %vm1150_vm3, %v1118_v22, %v1526_v53  ;;  %v1532_v62 = vmul.f32 %v1927_v40, %v1531_v55 }
 0x33a   : > { %1599 = vst.msk [vmem:[%s2251_s26 + $0xf0] sm:$0xff] %vm1568_vm1, %v1566_v49 }
 0x33d   : > { %v1931_v60 = vpop.eup %1930 }
 0x33e   : > { %v1529_v61 = vmul.f32 0.6931472, %v1931_v60 }
 0x340   : > { %v1535_v63 = vsel %vm1534_vm4, %v1532_v62, %v1529_v61 }
 0x341   : > { %v1567_v0 = vsel %vm1151_vm5, %v1119_v33, %v1535_v63 }
 0x342   : > { %1600 = vst.msk [vmem:[%s2251_s26 + $0xf8] sm:$0xff] %vm1568_vm1, %v1567_v0 }
 0x343 PF: > { %s20_s11 = sadd.s32 1, %s1939_s11  }
 0x344   : > { %p17_p4 = scmp.ge.s32.totalorder %s20_s11, 4  }
 0x346   :  { %19 = sbr.rel (!%p17_p4) target bundleno = 2 (0x2), region = 86 }

</bundles_post_ra>
